<compile_context>
chip_gen: v5e
topology: v5e:2x2
jax: 0.10.0
libtpu: 0.0.40
codegen_flags: <defaults>
</compile_context>

<pallas_src>
import functools

import jax
import jax.numpy as jnp
from jax.experimental import pallas as pl
from jax.experimental.pallas import tpu as pltpu

EPS = 1e-5


def residual_block_kernel(x_ref, hidx_ref, widx_ref, w1_ref, w2_ref,
                          g1_ref, b1_ref, g2_ref, b2_ref, o_ref,
                          *, H, W, compute_dtype):
    C, M = x_ref.shape
    x = x_ref[...]                      # (C, M) f32, lane-dense
    h_idx = hidx_ref[...]               # (1, M) int32
    w_idx = widx_ref[...]               # (1, M) int32

    # Border-validity masks per tap (shared by both convs; computed once).
    taps = [(dh, dw) for dh in (-1, 0, 1) for dw in (-1, 0, 1)]
    masks = []
    for dh, dw in taps:
        if dh == 0 and dw == 0:
            masks.append(None)
        else:
            masks.append((h_idx + dh >= 0) & (h_idx + dh < H) &
                         (w_idx + dw >= 0) & (w_idx + dw < W))

    def build_patches(y):
        """(C, M) -> (9*C, M): the 3x3 taps stacked along the contraction axis."""
        rows = []
        for (dh, dw), m in zip(taps, masks):
            if m is None:
                rows.append(y)
            else:
                s = dh * W + dw                                  # flat shift
                shifted = pltpu.roll(y, shift=(-s) % M, axis=1)  # XLU lane roll
                rows.append(jnp.where(m, shifted, jnp.zeros_like(shifted)))
        return jnp.concatenate(rows, axis=0)

    def batchnorm(acc, g, b):
        """One-pass batch stats over N*H*W (biased variance), folded scale/shift."""
        inv_m = 1.0 / M
        s = jnp.sum(acc, axis=1, keepdims=True)
        ss = jnp.sum(acc * acc, axis=1, keepdims=True)
        mu = s * inv_m
        var = jnp.maximum(ss * inv_m - mu * mu, 0.0)
        scale = g * jax.lax.rsqrt(var + EPS)
        shift = b - mu * scale
        return acc * scale + shift

    # ---- conv1 (single MXU contraction) -> bn1 -> relu ----
    p1 = build_patches(x).astype(compute_dtype)                   # (9C, M)
    acc1 = jnp.dot(w1_ref[...], p1, preferred_element_type=jnp.float32)
    y1 = jnp.maximum(batchnorm(acc1, g1_ref[...], b1_ref[...]), 0.0)

    # ---- conv2 -> bn2 ----
    p2 = build_patches(y1).astype(compute_dtype)
    acc2 = jnp.dot(w2_ref[...], p2, preferred_element_type=jnp.float32)
    y2 = batchnorm(acc2, g2_ref[...], b2_ref[...])

    # ---- identity residual (downsample=None) + relu; lane-dense store ----
    o_ref[...] = jnp.maximum(y2 + x, 0.0).astype(o_ref.dtype)


def residual_block(x_nchw, w1, w2, g1, b1, g2, b2, *,
                   compute_dtype=jnp.bfloat16):
    """x_nchw: (N,C,H,W) f32.  w*: (3,3,Cin,Cout) HWIO.  g*,b*: (Cout,)."""
    N, C, H, W = x_nchw.shape
    Cout = w1.shape[3]
    assert C == Cout, "no downsample: in_channels must equal out_channels"
    M = N * H * W
    assert M % 128 == 0, "N*H*W should be a multiple of 128 for lane-dense tiles"

    # channels-major, lane-dense layout (C, N*H*W)
    x_cm = jnp.transpose(x_nchw, (1, 0, 2, 3)).reshape(C, M).astype(jnp.float32)

    # (Cout, 9*Cin) weight matrices; row order = tap-major x Cin, matching patches
    w1_mat = jnp.transpose(w1.reshape(9 * C, Cout)).astype(compute_dtype)
    w2_mat = jnp.transpose(w2.reshape(9 * Cout, Cout)).astype(compute_dtype)

    # per-position spatial coordinates (for conv border masking inside the kernel)
    hw = jnp.arange(H * W, dtype=jnp.int32)
    h_idx = jnp.tile(hw // W, (N,)).reshape(1, M)
    w_idx = jnp.tile(hw % W, (N,)).reshape(1, M)

    g1r = g1.reshape(C, 1).astype(jnp.float32)
    b1r = b1.reshape(C, 1).astype(jnp.float32)
    g2r = g2.reshape(C, 1).astype(jnp.float32)
    b2r = b2.reshape(C, 1).astype(jnp.float32)

    def full(shape):
        nd = len(shape)
        return pl.BlockSpec(shape, lambda i, _nd=nd: (0,) * _nd)

    kernel = functools.partial(residual_block_kernel, H=H, W=W,
                               compute_dtype=compute_dtype)

    out_cm = pl.pallas_call(
        kernel,
        out_shape=jax.ShapeDtypeStruct((C, M), jnp.float32),
        grid=(1,),
        in_specs=[full(x_cm.shape), full(h_idx.shape), full(w_idx.shape),
                  full(w1_mat.shape), full(w2_mat.shape),
                  full(g1r.shape), full(b1r.shape),
                  full(g2r.shape), full(b2r.shape)],
        out_specs=full((C, M)),
        compiler_params=pltpu.CompilerParams(
            dimension_semantics=("arbitrary",)),
    )(x_cm, h_idx, w_idx, w1_mat, w2_mat, g1r, b1r, g2r, b2r)

    return jnp.transpose(out_cm.reshape(C, N, H, W), (1, 0, 2, 3))


def ref_block(x_nchw, w1, w2, g1, b1, g2, b2, conv_dtype=jnp.float32):
    """Pure-JAX reference (PyTorch training-mode forward)."""
    x = jnp.transpose(x_nchw, (0, 2, 3, 1)).astype(jnp.float32)

    def conv(y, w):
        return jax.lax.conv_general_dilated(
            y.astype(conv_dtype), w.astype(conv_dtype), (1, 1),
            ((1, 1), (1, 1)),
            dimension_numbers=('NHWC', 'HWIO', 'NHWC'),
            preferred_element_type=jnp.float32)

    def bn(y, g, b):
        mu = jnp.mean(y, axis=(0, 1, 2), keepdims=True)
        var = jnp.mean((y - mu) ** 2, axis=(0, 1, 2), keepdims=True)
        return (y - mu) * jax.lax.rsqrt(var + EPS) * g + b

    y = jax.nn.relu(bn(conv(x, w1), g1, b1))
    y = bn(conv(y, w2), g2, b2)
    y = jax.nn.relu(y + x)
    return jnp.transpose(y, (0, 3, 1, 2))


if __name__ == "__main__":
    key = jax.random.PRNGKey(0)
    kx, k1, k2, kg1, kb1, kg2, kb2 = jax.random.split(key, 7)

    N, C, H, W = 2, 4, 16, 16           # in_channels = out_channels = 4, stride = 1
    x = jax.random.normal(kx, (N, C, H, W), jnp.float32)
    w1 = 0.2 * jax.random.normal(k1, (3, 3, C, C), jnp.float32)   # conv1 (HWIO)
    w2 = 0.2 * jax.random.normal(k2, (3, 3, C, C), jnp.float32)   # conv2 (HWIO)
    g1 = 1.0 + 0.1 * jax.random.normal(kg1, (C,), jnp.float32)    # bn1 gamma
    b1 = 0.1 * jax.random.normal(kb1, (C,), jnp.float32)          # bn1 beta
    g2 = 1.0 + 0.1 * jax.random.normal(kg2, (C,), jnp.float32)    # bn2 gamma
    b2 = 0.1 * jax.random.normal(kb2, (C,), jnp.float32)          # bn2 beta

    # Fast path: bf16 MXU operands, f32 accumulation / BN / residual.
    out_fast = jax.block_until_ready(
        residual_block(x, w1, w2, g1, b1, g2, b2, compute_dtype=jnp.bfloat16))
    ref_fast = jax.block_until_ready(
        ref_block(x, w1, w2, g1, b1, g2, b2, conv_dtype=jnp.bfloat16))
    assert out_fast.shape == (N, C, H, W), out_fast.shape
    err_fast = float(jnp.max(jnp.abs(out_fast - ref_fast)))
    assert jnp.allclose(out_fast, ref_fast, atol=2e-2, rtol=2e-2), err_fast

    # Strict path: f32 MXU operands vs pure-f32 reference.
    out_f32 = jax.block_until_ready(
        residual_block(x, w1, w2, g1, b1, g2, b2, compute_dtype=jnp.float32))
    ref_f32 = jax.block_until_ready(ref_block(x, w1, w2, g1, b1, g2, b2))
    err_f32 = float(jnp.max(jnp.abs(out_f32 - ref_f32)))
    assert jnp.allclose(out_f32, ref_f32, atol=2e-2, rtol=2e-2), err_f32

    print("KERNEL_OK")
</pallas_src>

<mosaic_0001>
module attributes {stable_mosaic.version = 11 : i64} {
  func.func @residual_block_kernel(%arg0: i32, %arg1: memref<4x512xf32, #tpu.memory_space<vmem>>, %arg2: memref<1x512xi32, #tpu.memory_space<vmem>>, %arg3: memref<1x512xi32, #tpu.memory_space<vmem>>, %arg4: memref<4x36xbf16, #tpu.memory_space<vmem>>, %arg5: memref<4x36xbf16, #tpu.memory_space<vmem>>, %arg6: memref<4x1xf32, #tpu.memory_space<vmem>>, %arg7: memref<4x1xf32, #tpu.memory_space<vmem>>, %arg8: memref<4x1xf32, #tpu.memory_space<vmem>>, %arg9: memref<4x1xf32, #tpu.memory_space<vmem>>, %arg10: memref<4x512xf32, #tpu.memory_space<vmem>>) attributes {dimension_semantics = [#tpu.dimension_semantics<arbitrary>], iteration_bounds = array<i64: 1>, scalar_prefetch = 0 : i64, scratch_operands = 0 : i64, tpu.core_type = #tpu.core_type<tc>, window_params = [{pipeline_mode = #tpu.pipeline_mode<synchronous>, transform_indices = @transform_0, window_bounds = array<i64: 4, 512>}, {pipeline_mode = #tpu.pipeline_mode<synchronous>, transform_indices = @transform_1, window_bounds = array<i64: 1, 512>}, {pipeline_mode = #tpu.pipeline_mode<synchronous>, transform_indices = @transform_2, window_bounds = array<i64: 1, 512>}, {pipeline_mode = #tpu.pipeline_mode<synchronous>, transform_indices = @transform_3, window_bounds = array<i64: 4, 36>}, {pipeline_mode = #tpu.pipeline_mode<synchronous>, transform_indices = @transform_4, window_bounds = array<i64: 4, 36>}, {pipeline_mode = #tpu.pipeline_mode<synchronous>, transform_indices = @transform_5, window_bounds = array<i64: 4, 1>}, {pipeline_mode = #tpu.pipeline_mode<synchronous>, transform_indices = @transform_6, window_bounds = array<i64: 4, 1>}, {pipeline_mode = #tpu.pipeline_mode<synchronous>, transform_indices = @transform_7, window_bounds = array<i64: 4, 1>}, {pipeline_mode = #tpu.pipeline_mode<synchronous>, transform_indices = @transform_8, window_bounds = array<i64: 4, 1>}, {pipeline_mode = #tpu.pipeline_mode<synchronous>, transform_indices = @transform_9, window_bounds = array<i64: 4, 512>}]} {
    %c0 = arith.constant 0 : index
    %c0_0 = arith.constant 0 : index
    %0 = vector.load %arg1[%c0, %c0_0] : memref<4x512xf32, #tpu.memory_space<vmem>>, vector<4x512xf32>
    %c0_1 = arith.constant 0 : index
    %c0_2 = arith.constant 0 : index
    %1 = vector.load %arg2[%c0_1, %c0_2] : memref<1x512xi32, #tpu.memory_space<vmem>>, vector<1x512xi32>
    %c0_3 = arith.constant 0 : index
    %c0_4 = arith.constant 0 : index
    %2 = vector.load %arg3[%c0_3, %c0_4] : memref<1x512xi32, #tpu.memory_space<vmem>>, vector<1x512xi32>
    %c-1_i32 = arith.constant -1 : i32
    %3 = vector.broadcast %c-1_i32 : i32 to vector<1x512xi32>
    %4 = arith.addi %1, %3 : vector<1x512xi32>
    %c0_i32 = arith.constant 0 : i32
    %5 = vector.broadcast %c0_i32 : i32 to vector<1x512xi32>
    %6 = arith.cmpi sge, %4, %5 : vector<1x512xi32>
    %c-1_i32_5 = arith.constant -1 : i32
    %7 = vector.broadcast %c-1_i32_5 : i32 to vector<1x512xi32>
    %8 = arith.addi %1, %7 : vector<1x512xi32>
    %c16_i32 = arith.constant 16 : i32
    %9 = vector.broadcast %c16_i32 : i32 to vector<1x512xi32>
    %10 = arith.cmpi slt, %8, %9 : vector<1x512xi32>
    %11 = arith.andi %6, %10 : vector<1x512xi1>
    %c-1_i32_6 = arith.constant -1 : i32
    %12 = vector.broadcast %c-1_i32_6 : i32 to vector<1x512xi32>
    %13 = arith.addi %2, %12 : vector<1x512xi32>
    %c0_i32_7 = arith.constant 0 : i32
    %14 = vector.broadcast %c0_i32_7 : i32 to vector<1x512xi32>
    %15 = arith.cmpi sge, %13, %14 : vector<1x512xi32>
    %16 = arith.andi %11, %15 : vector<1x512xi1>
    %c-1_i32_8 = arith.constant -1 : i32
    %17 = vector.broadcast %c-1_i32_8 : i32 to vector<1x512xi32>
    %18 = arith.addi %2, %17 : vector<1x512xi32>
    %c16_i32_9 = arith.constant 16 : i32
    %19 = vector.broadcast %c16_i32_9 : i32 to vector<1x512xi32>
    %20 = arith.cmpi slt, %18, %19 : vector<1x512xi32>
    %21 = arith.andi %16, %20 : vector<1x512xi1>
    %c-1_i32_10 = arith.constant -1 : i32
    %22 = vector.broadcast %c-1_i32_10 : i32 to vector<1x512xi32>
    %23 = arith.addi %1, %22 : vector<1x512xi32>
    %c0_i32_11 = arith.constant 0 : i32
    %24 = vector.broadcast %c0_i32_11 : i32 to vector<1x512xi32>
    %25 = arith.cmpi sge, %23, %24 : vector<1x512xi32>
    %c-1_i32_12 = arith.constant -1 : i32
    %26 = vector.broadcast %c-1_i32_12 : i32 to vector<1x512xi32>
    %27 = arith.addi %1, %26 : vector<1x512xi32>
    %c16_i32_13 = arith.constant 16 : i32
    %28 = vector.broadcast %c16_i32_13 : i32 to vector<1x512xi32>
    %29 = arith.cmpi slt, %27, %28 : vector<1x512xi32>
    %30 = arith.andi %25, %29 : vector<1x512xi1>
    %c0_i32_14 = arith.constant 0 : i32
    %31 = vector.broadcast %c0_i32_14 : i32 to vector<1x512xi32>
    %32 = arith.addi %2, %31 : vector<1x512xi32>
    %c0_i32_15 = arith.constant 0 : i32
    %33 = vector.broadcast %c0_i32_15 : i32 to vector<1x512xi32>
    %34 = arith.cmpi sge, %32, %33 : vector<1x512xi32>
    %35 = arith.andi %30, %34 : vector<1x512xi1>
    %c0_i32_16 = arith.constant 0 : i32
    %36 = vector.broadcast %c0_i32_16 : i32 to vector<1x512xi32>
    %37 = arith.addi %2, %36 : vector<1x512xi32>
    %c16_i32_17 = arith.constant 16 : i32
    %38 = vector.broadcast %c16_i32_17 : i32 to vector<1x512xi32>
    %39 = arith.cmpi slt, %37, %38 : vector<1x512xi32>
    %40 = arith.andi %35, %39 : vector<1x512xi1>
    %c-1_i32_18 = arith.constant -1 : i32
    %41 = vector.broadcast %c-1_i32_18 : i32 to vector<1x512xi32>
    %42 = arith.addi %1, %41 : vector<1x512xi32>
    %c0_i32_19 = arith.constant 0 : i32
    %43 = vector.broadcast %c0_i32_19 : i32 to vector<1x512xi32>
    %44 = arith.cmpi sge, %42, %43 : vector<1x512xi32>
    %c-1_i32_20 = arith.constant -1 : i32
    %45 = vector.broadcast %c-1_i32_20 : i32 to vector<1x512xi32>
    %46 = arith.addi %1, %45 : vector<1x512xi32>
    %c16_i32_21 = arith.constant 16 : i32
    %47 = vector.broadcast %c16_i32_21 : i32 to vector<1x512xi32>
    %48 = arith.cmpi slt, %46, %47 : vector<1x512xi32>
    %49 = arith.andi %44, %48 : vector<1x512xi1>
    %c1_i32 = arith.constant 1 : i32
    %50 = vector.broadcast %c1_i32 : i32 to vector<1x512xi32>
    %51 = arith.addi %2, %50 : vector<1x512xi32>
    %c0_i32_22 = arith.constant 0 : i32
    %52 = vector.broadcast %c0_i32_22 : i32 to vector<1x512xi32>
    %53 = arith.cmpi sge, %51, %52 : vector<1x512xi32>
    %54 = arith.andi %49, %53 : vector<1x512xi1>
    %c1_i32_23 = arith.constant 1 : i32
    %55 = vector.broadcast %c1_i32_23 : i32 to vector<1x512xi32>
    %56 = arith.addi %2, %55 : vector<1x512xi32>
    %c16_i32_24 = arith.constant 16 : i32
    %57 = vector.broadcast %c16_i32_24 : i32 to vector<1x512xi32>
    %58 = arith.cmpi slt, %56, %57 : vector<1x512xi32>
    %59 = arith.andi %54, %58 : vector<1x512xi1>
    %c0_i32_25 = arith.constant 0 : i32
    %60 = vector.broadcast %c0_i32_25 : i32 to vector<1x512xi32>
    %61 = arith.addi %1, %60 : vector<1x512xi32>
    %c0_i32_26 = arith.constant 0 : i32
    %62 = vector.broadcast %c0_i32_26 : i32 to vector<1x512xi32>
    %63 = arith.cmpi sge, %61, %62 : vector<1x512xi32>
    %c0_i32_27 = arith.constant 0 : i32
    %64 = vector.broadcast %c0_i32_27 : i32 to vector<1x512xi32>
    %65 = arith.addi %1, %64 : vector<1x512xi32>
    %c16_i32_28 = arith.constant 16 : i32
    %66 = vector.broadcast %c16_i32_28 : i32 to vector<1x512xi32>
    %67 = arith.cmpi slt, %65, %66 : vector<1x512xi32>
    %68 = arith.andi %63, %67 : vector<1x512xi1>
    %c-1_i32_29 = arith.constant -1 : i32
    %69 = vector.broadcast %c-1_i32_29 : i32 to vector<1x512xi32>
    %70 = arith.addi %2, %69 : vector<1x512xi32>
    %c0_i32_30 = arith.constant 0 : i32
    %71 = vector.broadcast %c0_i32_30 : i32 to vector<1x512xi32>
    %72 = arith.cmpi sge, %70, %71 : vector<1x512xi32>
    %73 = arith.andi %68, %72 : vector<1x512xi1>
    %c-1_i32_31 = arith.constant -1 : i32
    %74 = vector.broadcast %c-1_i32_31 : i32 to vector<1x512xi32>
    %75 = arith.addi %2, %74 : vector<1x512xi32>
    %c16_i32_32 = arith.constant 16 : i32
    %76 = vector.broadcast %c16_i32_32 : i32 to vector<1x512xi32>
    %77 = arith.cmpi slt, %75, %76 : vector<1x512xi32>
    %78 = arith.andi %73, %77 : vector<1x512xi1>
    %c0_i32_33 = arith.constant 0 : i32
    %79 = vector.broadcast %c0_i32_33 : i32 to vector<1x512xi32>
    %80 = arith.addi %1, %79 : vector<1x512xi32>
    %c0_i32_34 = arith.constant 0 : i32
    %81 = vector.broadcast %c0_i32_34 : i32 to vector<1x512xi32>
    %82 = arith.cmpi sge, %80, %81 : vector<1x512xi32>
    %c0_i32_35 = arith.constant 0 : i32
    %83 = vector.broadcast %c0_i32_35 : i32 to vector<1x512xi32>
    %84 = arith.addi %1, %83 : vector<1x512xi32>
    %c16_i32_36 = arith.constant 16 : i32
    %85 = vector.broadcast %c16_i32_36 : i32 to vector<1x512xi32>
    %86 = arith.cmpi slt, %84, %85 : vector<1x512xi32>
    %87 = arith.andi %82, %86 : vector<1x512xi1>
    %c1_i32_37 = arith.constant 1 : i32
    %88 = vector.broadcast %c1_i32_37 : i32 to vector<1x512xi32>
    %89 = arith.addi %2, %88 : vector<1x512xi32>
    %c0_i32_38 = arith.constant 0 : i32
    %90 = vector.broadcast %c0_i32_38 : i32 to vector<1x512xi32>
    %91 = arith.cmpi sge, %89, %90 : vector<1x512xi32>
    %92 = arith.andi %87, %91 : vector<1x512xi1>
    %c1_i32_39 = arith.constant 1 : i32
    %93 = vector.broadcast %c1_i32_39 : i32 to vector<1x512xi32>
    %94 = arith.addi %2, %93 : vector<1x512xi32>
    %c16_i32_40 = arith.constant 16 : i32
    %95 = vector.broadcast %c16_i32_40 : i32 to vector<1x512xi32>
    %96 = arith.cmpi slt, %94, %95 : vector<1x512xi32>
    %97 = arith.andi %92, %96 : vector<1x512xi1>
    %c1_i32_41 = arith.constant 1 : i32
    %98 = vector.broadcast %c1_i32_41 : i32 to vector<1x512xi32>
    %99 = arith.addi %1, %98 : vector<1x512xi32>
    %c0_i32_42 = arith.constant 0 : i32
    %100 = vector.broadcast %c0_i32_42 : i32 to vector<1x512xi32>
    %101 = arith.cmpi sge, %99, %100 : vector<1x512xi32>
    %c1_i32_43 = arith.constant 1 : i32
    %102 = vector.broadcast %c1_i32_43 : i32 to vector<1x512xi32>
    %103 = arith.addi %1, %102 : vector<1x512xi32>
    %c16_i32_44 = arith.constant 16 : i32
    %104 = vector.broadcast %c16_i32_44 : i32 to vector<1x512xi32>
    %105 = arith.cmpi slt, %103, %104 : vector<1x512xi32>
    %106 = arith.andi %101, %105 : vector<1x512xi1>
    %c-1_i32_45 = arith.constant -1 : i32
    %107 = vector.broadcast %c-1_i32_45 : i32 to vector<1x512xi32>
    %108 = arith.addi %2, %107 : vector<1x512xi32>
    %c0_i32_46 = arith.constant 0 : i32
    %109 = vector.broadcast %c0_i32_46 : i32 to vector<1x512xi32>
    %110 = arith.cmpi sge, %108, %109 : vector<1x512xi32>
    %111 = arith.andi %106, %110 : vector<1x512xi1>
    %c-1_i32_47 = arith.constant -1 : i32
    %112 = vector.broadcast %c-1_i32_47 : i32 to vector<1x512xi32>
    %113 = arith.addi %2, %112 : vector<1x512xi32>
    %c16_i32_48 = arith.constant 16 : i32
    %114 = vector.broadcast %c16_i32_48 : i32 to vector<1x512xi32>
    %115 = arith.cmpi slt, %113, %114 : vector<1x512xi32>
    %116 = arith.andi %111, %115 : vector<1x512xi1>
    %c1_i32_49 = arith.constant 1 : i32
    %117 = vector.broadcast %c1_i32_49 : i32 to vector<1x512xi32>
    %118 = arith.addi %1, %117 : vector<1x512xi32>
    %c0_i32_50 = arith.constant 0 : i32
    %119 = vector.broadcast %c0_i32_50 : i32 to vector<1x512xi32>
    %120 = arith.cmpi sge, %118, %119 : vector<1x512xi32>
    %c1_i32_51 = arith.constant 1 : i32
    %121 = vector.broadcast %c1_i32_51 : i32 to vector<1x512xi32>
    %122 = arith.addi %1, %121 : vector<1x512xi32>
    %c16_i32_52 = arith.constant 16 : i32
    %123 = vector.broadcast %c16_i32_52 : i32 to vector<1x512xi32>
    %124 = arith.cmpi slt, %122, %123 : vector<1x512xi32>
    %125 = arith.andi %120, %124 : vector<1x512xi1>
    %c0_i32_53 = arith.constant 0 : i32
    %126 = vector.broadcast %c0_i32_53 : i32 to vector<1x512xi32>
    %127 = arith.addi %2, %126 : vector<1x512xi32>
    %c0_i32_54 = arith.constant 0 : i32
    %128 = vector.broadcast %c0_i32_54 : i32 to vector<1x512xi32>
    %129 = arith.cmpi sge, %127, %128 : vector<1x512xi32>
    %130 = arith.andi %125, %129 : vector<1x512xi1>
    %c0_i32_55 = arith.constant 0 : i32
    %131 = vector.broadcast %c0_i32_55 : i32 to vector<1x512xi32>
    %132 = arith.addi %2, %131 : vector<1x512xi32>
    %c16_i32_56 = arith.constant 16 : i32
    %133 = vector.broadcast %c16_i32_56 : i32 to vector<1x512xi32>
    %134 = arith.cmpi slt, %132, %133 : vector<1x512xi32>
    %135 = arith.andi %130, %134 : vector<1x512xi1>
    %c1_i32_57 = arith.constant 1 : i32
    %136 = vector.broadcast %c1_i32_57 : i32 to vector<1x512xi32>
    %137 = arith.addi %1, %136 : vector<1x512xi32>
    %c0_i32_58 = arith.constant 0 : i32
    %138 = vector.broadcast %c0_i32_58 : i32 to vector<1x512xi32>
    %139 = arith.cmpi sge, %137, %138 : vector<1x512xi32>
    %c1_i32_59 = arith.constant 1 : i32
    %140 = vector.broadcast %c1_i32_59 : i32 to vector<1x512xi32>
    %141 = arith.addi %1, %140 : vector<1x512xi32>
    %c16_i32_60 = arith.constant 16 : i32
    %142 = vector.broadcast %c16_i32_60 : i32 to vector<1x512xi32>
    %143 = arith.cmpi slt, %141, %142 : vector<1x512xi32>
    %144 = arith.andi %139, %143 : vector<1x512xi1>
    %c1_i32_61 = arith.constant 1 : i32
    %145 = vector.broadcast %c1_i32_61 : i32 to vector<1x512xi32>
    %146 = arith.addi %2, %145 : vector<1x512xi32>
    %c0_i32_62 = arith.constant 0 : i32
    %147 = vector.broadcast %c0_i32_62 : i32 to vector<1x512xi32>
    %148 = arith.cmpi sge, %146, %147 : vector<1x512xi32>
    %149 = arith.andi %144, %148 : vector<1x512xi1>
    %c1_i32_63 = arith.constant 1 : i32
    %150 = vector.broadcast %c1_i32_63 : i32 to vector<1x512xi32>
    %151 = arith.addi %2, %150 : vector<1x512xi32>
    %c16_i32_64 = arith.constant 16 : i32
    %152 = vector.broadcast %c16_i32_64 : i32 to vector<1x512xi32>
    %153 = arith.cmpi slt, %151, %152 : vector<1x512xi32>
    %154 = arith.andi %149, %153 : vector<1x512xi1>
    %c17_i32 = arith.constant 17 : i32
    %155 = tpu.dynamic_rotate %0 by %c17_i32 dim 1 : vector<4x512xf32>, i32 -> vector<4x512xf32>
    %cst = arith.constant 0.000000e+00 : f32
    %156 = vector.broadcast %cst : f32 to vector<4x512xf32>
    %157 = vector.shape_cast %21 : vector<1x512xi1> to vector<1x512xi1>
    %158 = vector.broadcast %157 : vector<1x512xi1> to vector<4x512xi1>
    %159 = arith.select %158, %155, %156 : vector<4x512xi1>, vector<4x512xf32>
    %c16_i32_65 = arith.constant 16 : i32
    %160 = tpu.dynamic_rotate %0 by %c16_i32_65 dim 1 : vector<4x512xf32>, i32 -> vector<4x512xf32>
    %cst_66 = arith.constant 0.000000e+00 : f32
    %161 = vector.broadcast %cst_66 : f32 to vector<4x512xf32>
    %162 = vector.shape_cast %40 : vector<1x512xi1> to vector<1x512xi1>
    %163 = vector.broadcast %162 : vector<1x512xi1> to vector<4x512xi1>
    %164 = arith.select %163, %160, %161 : vector<4x512xi1>, vector<4x512xf32>
    %c15_i32 = arith.constant 15 : i32
    %165 = tpu.dynamic_rotate %0 by %c15_i32 dim 1 : vector<4x512xf32>, i32 -> vector<4x512xf32>
    %cst_67 = arith.constant 0.000000e+00 : f32
    %166 = vector.broadcast %cst_67 : f32 to vector<4x512xf32>
    %167 = vector.shape_cast %59 : vector<1x512xi1> to vector<1x512xi1>
    %168 = vector.broadcast %167 : vector<1x512xi1> to vector<4x512xi1>
    %169 = arith.select %168, %165, %166 : vector<4x512xi1>, vector<4x512xf32>
    %c1_i32_68 = arith.constant 1 : i32
    %170 = tpu.dynamic_rotate %0 by %c1_i32_68 dim 1 : vector<4x512xf32>, i32 -> vector<4x512xf32>
    %cst_69 = arith.constant 0.000000e+00 : f32
    %171 = vector.broadcast %cst_69 : f32 to vector<4x512xf32>
    %172 = vector.shape_cast %78 : vector<1x512xi1> to vector<1x512xi1>
    %173 = vector.broadcast %172 : vector<1x512xi1> to vector<4x512xi1>
    %174 = arith.select %173, %170, %171 : vector<4x512xi1>, vector<4x512xf32>
    %c511_i32 = arith.constant 511 : i32
    %175 = tpu.dynamic_rotate %0 by %c511_i32 dim 1 : vector<4x512xf32>, i32 -> vector<4x512xf32>
    %cst_70 = arith.constant 0.000000e+00 : f32
    %176 = vector.broadcast %cst_70 : f32 to vector<4x512xf32>
    %177 = vector.shape_cast %97 : vector<1x512xi1> to vector<1x512xi1>
    %178 = vector.broadcast %177 : vector<1x512xi1> to vector<4x512xi1>
    %179 = arith.select %178, %175, %176 : vector<4x512xi1>, vector<4x512xf32>
    %c497_i32 = arith.constant 497 : i32
    %180 = tpu.dynamic_rotate %0 by %c497_i32 dim 1 : vector<4x512xf32>, i32 -> vector<4x512xf32>
    %cst_71 = arith.constant 0.000000e+00 : f32
    %181 = vector.broadcast %cst_71 : f32 to vector<4x512xf32>
    %182 = vector.shape_cast %116 : vector<1x512xi1> to vector<1x512xi1>
    %183 = vector.broadcast %182 : vector<1x512xi1> to vector<4x512xi1>
    %184 = arith.select %183, %180, %181 : vector<4x512xi1>, vector<4x512xf32>
    %c496_i32 = arith.constant 496 : i32
    %185 = tpu.dynamic_rotate %0 by %c496_i32 dim 1 : vector<4x512xf32>, i32 -> vector<4x512xf32>
    %cst_72 = arith.constant 0.000000e+00 : f32
    %186 = vector.broadcast %cst_72 : f32 to vector<4x512xf32>
    %187 = vector.shape_cast %135 : vector<1x512xi1> to vector<1x512xi1>
    %188 = vector.broadcast %187 : vector<1x512xi1> to vector<4x512xi1>
    %189 = arith.select %188, %185, %186 : vector<4x512xi1>, vector<4x512xf32>
    %c495_i32 = arith.constant 495 : i32
    %190 = tpu.dynamic_rotate %0 by %c495_i32 dim 1 : vector<4x512xf32>, i32 -> vector<4x512xf32>
    %cst_73 = arith.constant 0.000000e+00 : f32
    %191 = vector.broadcast %cst_73 : f32 to vector<4x512xf32>
    %192 = vector.shape_cast %154 : vector<1x512xi1> to vector<1x512xi1>
    %193 = vector.broadcast %192 : vector<1x512xi1> to vector<4x512xi1>
    %194 = arith.select %193, %190, %191 : vector<4x512xi1>, vector<4x512xf32>
    %195 = tpu.concatenate %159, %164, %169, %174, %0, %179, %184, %189, %194 in 0 : vector<4x512xf32>, vector<4x512xf32>, vector<4x512xf32>, vector<4x512xf32>, vector<4x512xf32>, vector<4x512xf32>, vector<4x512xf32>, vector<4x512xf32>, vector<4x512xf32> -> vector<36x512xf32>
    %196 = arith.truncf %195 : vector<36x512xf32> to vector<36x512xbf16>
    %c0_74 = arith.constant 0 : index
    %c0_75 = arith.constant 0 : index
    %197 = vector.load %arg4[%c0_74, %c0_75] : memref<4x36xbf16, #tpu.memory_space<vmem>>, vector<4x36xbf16>
    %cst_76 = arith.constant dense<0.000000e+00> : vector<4x512xf32>
    %198 = tpu.matmul %197, %196, %cst_76 {dimension_numbers = #tpu.dot_dimension_numbers<[1], [0], [0], [1], [0, 0, 1, 1], [], []>} : vector<4x36xbf16>, vector<36x512xbf16>, vector<4x512xf32> -> vector<4x512xf32>
    %c0_77 = arith.constant 0 : index
    %c0_78 = arith.constant 0 : index
    %199 = vector.load %arg6[%c0_77, %c0_78] : memref<4x1xf32, #tpu.memory_space<vmem>>, vector<4x1xf32>
    %c0_79 = arith.constant 0 : index
    %c0_80 = arith.constant 0 : index
    %200 = vector.load %arg7[%c0_79, %c0_80] : memref<4x1xf32, #tpu.memory_space<vmem>>, vector<4x1xf32>
    %cst_81 = arith.constant dense<0.000000e+00> : vector<4xf32>
    %201 = vector.multi_reduction <add>, %198, %cst_81 [1] : vector<4x512xf32> to vector<4xf32>
    %202 = vector.shape_cast %201 : vector<4xf32> to vector<4x1xf32>
    %203 = arith.mulf %198, %198 : vector<4x512xf32>
    %cst_82 = arith.constant dense<0.000000e+00> : vector<4xf32>
    %204 = vector.multi_reduction <add>, %203, %cst_82 [1] : vector<4x512xf32> to vector<4xf32>
    %205 = vector.shape_cast %204 : vector<4xf32> to vector<4x1xf32>
    %cst_83 = arith.constant 0.001953125 : f32
    %206 = vector.broadcast %cst_83 : f32 to vector<4x1xf32>
    %207 = arith.mulf %202, %206 : vector<4x1xf32>
    %cst_84 = arith.constant 0.001953125 : f32
    %208 = vector.broadcast %cst_84 : f32 to vector<4x1xf32>
    %209 = arith.mulf %205, %208 : vector<4x1xf32>
    %210 = arith.mulf %207, %207 : vector<4x1xf32>
    %211 = arith.subf %209, %210 : vector<4x1xf32>
    %cst_85 = arith.constant 0.000000e+00 : f32
    %212 = vector.broadcast %cst_85 : f32 to vector<4x1xf32>
    %213 = arith.maximumf %211, %212 : vector<4x1xf32>
    %cst_86 = arith.constant 9.99999974E-6 : f32
    %214 = vector.broadcast %cst_86 : f32 to vector<4x1xf32>
    %215 = arith.addf %213, %214 : vector<4x1xf32>
    %216 = math.rsqrt %215 : vector<4x1xf32>
    %217 = arith.mulf %199, %216 : vector<4x1xf32>
    %218 = arith.mulf %207, %217 : vector<4x1xf32>
    %219 = arith.subf %200, %218 : vector<4x1xf32>
    %220 = vector.broadcast %217 : vector<4x1xf32> to vector<4x512xf32>
    %221 = arith.mulf %198, %220 : vector<4x512xf32>
    %222 = vector.broadcast %219 : vector<4x1xf32> to vector<4x512xf32>
    %223 = arith.addf %221, %222 : vector<4x512xf32>
    %cst_87 = arith.constant 0.000000e+00 : f32
    %224 = vector.broadcast %cst_87 : f32 to vector<4x512xf32>
    %225 = arith.maximumf %223, %224 : vector<4x512xf32>
    %c17_i32_88 = arith.constant 17 : i32
    %226 = tpu.dynamic_rotate %225 by %c17_i32_88 dim 1 : vector<4x512xf32>, i32 -> vector<4x512xf32>
    %cst_89 = arith.constant 0.000000e+00 : f32
    %227 = vector.broadcast %cst_89 : f32 to vector<4x512xf32>
    %228 = vector.shape_cast %21 : vector<1x512xi1> to vector<1x512xi1>
    %229 = vector.broadcast %228 : vector<1x512xi1> to vector<4x512xi1>
    %230 = arith.select %229, %226, %227 : vector<4x512xi1>, vector<4x512xf32>
    %c16_i32_90 = arith.constant 16 : i32
    %231 = tpu.dynamic_rotate %225 by %c16_i32_90 dim 1 : vector<4x512xf32>, i32 -> vector<4x512xf32>
    %cst_91 = arith.constant 0.000000e+00 : f32
    %232 = vector.broadcast %cst_91 : f32 to vector<4x512xf32>
    %233 = vector.shape_cast %40 : vector<1x512xi1> to vector<1x512xi1>
    %234 = vector.broadcast %233 : vector<1x512xi1> to vector<4x512xi1>
    %235 = arith.select %234, %231, %232 : vector<4x512xi1>, vector<4x512xf32>
    %c15_i32_92 = arith.constant 15 : i32
    %236 = tpu.dynamic_rotate %225 by %c15_i32_92 dim 1 : vector<4x512xf32>, i32 -> vector<4x512xf32>
    %cst_93 = arith.constant 0.000000e+00 : f32
    %237 = vector.broadcast %cst_93 : f32 to vector<4x512xf32>
    %238 = vector.shape_cast %59 : vector<1x512xi1> to vector<1x512xi1>
    %239 = vector.broadcast %238 : vector<1x512xi1> to vector<4x512xi1>
    %240 = arith.select %239, %236, %237 : vector<4x512xi1>, vector<4x512xf32>
    %c1_i32_94 = arith.constant 1 : i32
    %241 = tpu.dynamic_rotate %225 by %c1_i32_94 dim 1 : vector<4x512xf32>, i32 -> vector<4x512xf32>
    %cst_95 = arith.constant 0.000000e+00 : f32
    %242 = vector.broadcast %cst_95 : f32 to vector<4x512xf32>
    %243 = vector.shape_cast %78 : vector<1x512xi1> to vector<1x512xi1>
    %244 = vector.broadcast %243 : vector<1x512xi1> to vector<4x512xi1>
    %245 = arith.select %244, %241, %242 : vector<4x512xi1>, vector<4x512xf32>
    %c511_i32_96 = arith.constant 511 : i32
    %246 = tpu.dynamic_rotate %225 by %c511_i32_96 dim 1 : vector<4x512xf32>, i32 -> vector<4x512xf32>
    %cst_97 = arith.constant 0.000000e+00 : f32
    %247 = vector.broadcast %cst_97 : f32 to vector<4x512xf32>
    %248 = vector.shape_cast %97 : vector<1x512xi1> to vector<1x512xi1>
    %249 = vector.broadcast %248 : vector<1x512xi1> to vector<4x512xi1>
    %250 = arith.select %249, %246, %247 : vector<4x512xi1>, vector<4x512xf32>
    %c497_i32_98 = arith.constant 497 : i32
    %251 = tpu.dynamic_rotate %225 by %c497_i32_98 dim 1 : vector<4x512xf32>, i32 -> vector<4x512xf32>
    %cst_99 = arith.constant 0.000000e+00 : f32
    %252 = vector.broadcast %cst_99 : f32 to vector<4x512xf32>
    %253 = vector.shape_cast %116 : vector<1x512xi1> to vector<1x512xi1>
    %254 = vector.broadcast %253 : vector<1x512xi1> to vector<4x512xi1>
    %255 = arith.select %254, %251, %252 : vector<4x512xi1>, vector<4x512xf32>
    %c496_i32_100 = arith.constant 496 : i32
    %256 = tpu.dynamic_rotate %225 by %c496_i32_100 dim 1 : vector<4x512xf32>, i32 -> vector<4x512xf32>
    %cst_101 = arith.constant 0.000000e+00 : f32
    %257 = vector.broadcast %cst_101 : f32 to vector<4x512xf32>
    %258 = vector.shape_cast %135 : vector<1x512xi1> to vector<1x512xi1>
    %259 = vector.broadcast %258 : vector<1x512xi1> to vector<4x512xi1>
    %260 = arith.select %259, %256, %257 : vector<4x512xi1>, vector<4x512xf32>
    %c495_i32_102 = arith.constant 495 : i32
    %261 = tpu.dynamic_rotate %225 by %c495_i32_102 dim 1 : vector<4x512xf32>, i32 -> vector<4x512xf32>
    %cst_103 = arith.constant 0.000000e+00 : f32
    %262 = vector.broadcast %cst_103 : f32 to vector<4x512xf32>
    %263 = vector.shape_cast %154 : vector<1x512xi1> to vector<1x512xi1>
    %264 = vector.broadcast %263 : vector<1x512xi1> to vector<4x512xi1>
    %265 = arith.select %264, %261, %262 : vector<4x512xi1>, vector<4x512xf32>
    %266 = tpu.concatenate %230, %235, %240, %245, %225, %250, %255, %260, %265 in 0 : vector<4x512xf32>, vector<4x512xf32>, vector<4x512xf32>, vector<4x512xf32>, vector<4x512xf32>, vector<4x512xf32>, vector<4x512xf32>, vector<4x512xf32>, vector<4x512xf32> -> vector<36x512xf32>
    %267 = arith.truncf %266 : vector<36x512xf32> to vector<36x512xbf16>
    %c0_104 = arith.constant 0 : index
    %c0_105 = arith.constant 0 : index
    %268 = vector.load %arg5[%c0_104, %c0_105] : memref<4x36xbf16, #tpu.memory_space<vmem>>, vector<4x36xbf16>
    %cst_106 = arith.constant dense<0.000000e+00> : vector<4x512xf32>
    %269 = tpu.matmul %268, %267, %cst_106 {dimension_numbers = #tpu.dot_dimension_numbers<[1], [0], [0], [1], [0, 0, 1, 1], [], []>} : vector<4x36xbf16>, vector<36x512xbf16>, vector<4x512xf32> -> vector<4x512xf32>
    %c0_107 = arith.constant 0 : index
    %c0_108 = arith.constant 0 : index
    %270 = vector.load %arg8[%c0_107, %c0_108] : memref<4x1xf32, #tpu.memory_space<vmem>>, vector<4x1xf32>
    %c0_109 = arith.constant 0 : index
    %c0_110 = arith.constant 0 : index
    %271 = vector.load %arg9[%c0_109, %c0_110] : memref<4x1xf32, #tpu.memory_space<vmem>>, vector<4x1xf32>
    %cst_111 = arith.constant dense<0.000000e+00> : vector<4xf32>
    %272 = vector.multi_reduction <add>, %269, %cst_111 [1] : vector<4x512xf32> to vector<4xf32>
    %273 = vector.shape_cast %272 : vector<4xf32> to vector<4x1xf32>
    %274 = arith.mulf %269, %269 : vector<4x512xf32>
    %cst_112 = arith.constant dense<0.000000e+00> : vector<4xf32>
    %275 = vector.multi_reduction <add>, %274, %cst_112 [1] : vector<4x512xf32> to vector<4xf32>
    %276 = vector.shape_cast %275 : vector<4xf32> to vector<4x1xf32>
    %cst_113 = arith.constant 0.001953125 : f32
    %277 = vector.broadcast %cst_113 : f32 to vector<4x1xf32>
    %278 = arith.mulf %273, %277 : vector<4x1xf32>
    %cst_114 = arith.constant 0.001953125 : f32
    %279 = vector.broadcast %cst_114 : f32 to vector<4x1xf32>
    %280 = arith.mulf %276, %279 : vector<4x1xf32>
    %281 = arith.mulf %278, %278 : vector<4x1xf32>
    %282 = arith.subf %280, %281 : vector<4x1xf32>
    %cst_115 = arith.constant 0.000000e+00 : f32
    %283 = vector.broadcast %cst_115 : f32 to vector<4x1xf32>
    %284 = arith.maximumf %282, %283 : vector<4x1xf32>
    %cst_116 = arith.constant 9.99999974E-6 : f32
    %285 = vector.broadcast %cst_116 : f32 to vector<4x1xf32>
    %286 = arith.addf %284, %285 : vector<4x1xf32>
    %287 = math.rsqrt %286 : vector<4x1xf32>
    %288 = arith.mulf %270, %287 : vector<4x1xf32>
    %289 = arith.mulf %278, %288 : vector<4x1xf32>
    %290 = arith.subf %271, %289 : vector<4x1xf32>
    %291 = vector.broadcast %288 : vector<4x1xf32> to vector<4x512xf32>
    %292 = arith.mulf %269, %291 : vector<4x512xf32>
    %293 = vector.broadcast %290 : vector<4x1xf32> to vector<4x512xf32>
    %294 = arith.addf %292, %293 : vector<4x512xf32>
    %295 = arith.addf %294, %0 : vector<4x512xf32>
    %cst_117 = arith.constant 0.000000e+00 : f32
    %296 = vector.broadcast %cst_117 : f32 to vector<4x512xf32>
    %297 = arith.maximumf %295, %296 : vector<4x512xf32>
    %c0_118 = arith.constant 0 : index
    %c0_119 = arith.constant 0 : index
    %298 = vector.load %arg10[%c0_118, %c0_119] : memref<4x512xf32, #tpu.memory_space<vmem>>, vector<4x512xf32>
    tpu.vector_store %arg10[%c0_118, %c0_119], %297 {strides = array<i32>} : memref<4x512xf32, #tpu.memory_space<vmem>>, vector<4x512xf32>,
    return
  }
  func.func @transform_0(%arg0: i32) -> (i32, i32) {
    %c0_i32 = arith.constant 0 : i32
    %c0_i32_0 = arith.constant 0 : i32
    %c0_i32_1 = arith.constant 0 : i32
    return %c0_i32, %c0_i32_0 : i32, i32
  }
  func.func @transform_1(%arg0: i32) -> (i32, i32) {
    %c0_i32 = arith.constant 0 : i32
    %c0_i32_0 = arith.constant 0 : i32
    %c0_i32_1 = arith.constant 0 : i32
    return %c0_i32, %c0_i32_0 : i32, i32
  }
  func.func @transform_2(%arg0: i32) -> (i32, i32) {
    %c0_i32 = arith.constant 0 : i32
    %c0_i32_0 = arith.constant 0 : i32
    %c0_i32_1 = arith.constant 0 : i32
    return %c0_i32, %c0_i32_0 : i32, i32
  }
  func.func @transform_3(%arg0: i32) -> (i32, i32) {
    %c0_i32 = arith.constant 0 : i32
    %c0_i32_0 = arith.constant 0 : i32
    %c0_i32_1 = arith.constant 0 : i32
    return %c0_i32, %c0_i32_0 : i32, i32
  }
  func.func @transform_4(%arg0: i32) -> (i32, i32) {
    %c0_i32 = arith.constant 0 : i32
    %c0_i32_0 = arith.constant 0 : i32
    %c0_i32_1 = arith.constant 0 : i32
    return %c0_i32, %c0_i32_0 : i32, i32
  }
  func.func @transform_5(%arg0: i32) -> (i32, i32) {
    %c0_i32 = arith.constant 0 : i32
    %c0_i32_0 = arith.constant 0 : i32
    %c0_i32_1 = arith.constant 0 : i32
    return %c0_i32, %c0_i32_0 : i32, i32
  }
  func.func @transform_6(%arg0: i32) -> (i32, i32) {
    %c0_i32 = arith.constant 0 : i32
    %c0_i32_0 = arith.constant 0 : i32
    %c0_i32_1 = arith.constant 0 : i32
    return %c0_i32, %c0_i32_0 : i32, i32
  }
  func.func @transform_7(%arg0: i32) -> (i32, i32) {
    %c0_i32 = arith.constant 0 : i32
    %c0_i32_0 = arith.constant 0 : i32
    %c0_i32_1 = arith.constant 0 : i32
    return %c0_i32, %c0_i32_0 : i32, i32
  }
  func.func @transform_8(%arg0: i32) -> (i32, i32) {
    %c0_i32 = arith.constant 0 : i32
    %c0_i32_0 = arith.constant 0 : i32
    %c0_i32_1 = arith.constant 0 : i32
    return %c0_i32, %c0_i32_0 : i32, i32
  }
  func.func @transform_9(%arg0: i32) -> (i32, i32) {
    %c0_i32 = arith.constant 0 : i32
    %c0_i32_0 = arith.constant 0 : i32
    %c0_i32_1 = arith.constant 0 : i32
    return %c0_i32, %c0_i32_0 : i32, i32
  }
}

</mosaic_0001>

<bundles_post_ra>
// kernel: tpu_custom_call.1
= control target key start
LH: loop header
LB: loop body
LE: loop exit
PB: predicated region body
PF: predicated region fallthrough
CT: control target
= control target key end

     0   :  { %14 = vsyncpa [#allocation3], 0  ;;  %s2177_s0 = inlined_call_operand.hbm [shape: f32[4,512], index: 0, kind: input, shape index: {}]   ;;  %s2178_s1 = inlined_call_operand.vmem [shape: s32[1,512], index: 1, kind: input, shape index: {}]   ;;  %s2179_s2 = inlined_call_operand.vmem [shape: s32[1,512], index: 2, kind: input, shape index: {}]   ;;  %s2180_s3 = inlined_call_operand.vmem [shape: bf16[4,36], index: 3, kind: input, shape index: {}]   ;;  %s2181_s4 = inlined_call_operand.vmem [shape: bf16[4,36], index: 4, kind: input, shape index: {}]   ;;  %s2182_s5 = inlined_call_operand.vmem [shape: f32[4,1], index: 5, kind: input, shape index: {}]   ;;  %s2183_s6 = inlined_call_operand.vmem [shape: f32[4,1], index: 6, kind: input, shape index: {}]   ;;  %s2184_s7 = inlined_call_operand.vmem [shape: f32[4,1], index: 7, kind: input, shape index: {}]   ;;  %s2185_s8 = inlined_call_operand.vmem [shape: f32[4,1], index: 8, kind: input, shape index: {}]   ;;  %s2186_s9 = inlined_call_operand.hbm [shape: f32[4,512], index: 9, kind: output, shape index: {}]  }
   0x1   :  { %15 = vsyncpa [#allocation4], 0  ;;  %s21_s11 = sshll.u32 %s2177_s0, 4  ;;  %s1227_s12 = smov [#allocation2]   ;;  %s22_s11 = int_to_ptr.hbm [resolvable:$true] %s21_s11 }
   0x2   :  { %s23_s13 = sshll.u32 %s1227_s12, 4  ;;  %s24_s13 = int_to_ptr.vmem [resolvable:$true] %s23_s13 }
   0x3   :  { %26 = dma.hbm_to_vmem [thread:$0]  %s22_s11, 256, %s24_s13, [#allocation3]  }
   0x4   :  { %1223 = dma.done.wait [#allocation3], 256  }
   0x5   :  { %1224 = vsyncadd [#allocation3], 4294967040  ;;  %v1291_v0 = vld [vmem:[#allocation2] sm:$0xff]  ;;  %v1293_v1 = vld [vmem:[#allocation2 + $0x8] sm:$0xff]  ;;  %s1228_s0 = smov 17   ;;  %s1229_s14 = smov 16  }
   0x6   :  { %89 = vst [vmem:[#allocation1] ss:$2 sm:$0xff] %v1291_v0  ;;  %s1230_s15 = smov 1   ;;  %s1231_s16 = smov 127   ;;  %v1236_v50 = vmov 0  }
   0x7   :  { %91 = vst [vmem:[#allocation1 + $0x10] ss:$2 sm:$0xff] %v1293_v1  ;;  %s1232_s17 = smov 113   ;;  %s1233_s18 = smov 112   ;;  %1090 = vset.pattern.permute.xlu0 %v1236_v50  ;;  %v1354_v54 = vld [vmem:[%s2179_s2] sm:$0xf] }
   0x8   :  { %s1234_s19 = smov 111   ;;  %s1235_s20 = smov 15   ;;  %v50_v55 = vld [vmem:[%s2178_s1] sm:$0xf]  ;;  %v1361_v57 = vadd.s32 1, %v1354_v54  ;;  %v56_v62 = vadd.s32 4294967295, %v1354_v54 }
   0x9   :  { %v77_v56 = vadd.s32 1, %v50_v55  ;;  %vm70_vm0 = vcmp.ge.s32.totalorder %v50_v55, 0  ;;  %vm71_vm1 = vcmp.lt.s32.totalorder %v50_v55, 16  ;;  %v52_v59 = vadd.s32 4294967295, %v50_v55  ;;  %s981_s12 = sshll.u32 %s2186_s9, 4  ;;  %s982_s12 = int_to_ptr.hbm [resolvable:$true] %s981_s12 }
   0xa   :  { %vm2188_vm4 = vcmp.ge.s32.totalorder %v1361_v57, 0  ;;  %vm1368_vm5 = vmand %vm70_vm0, %vm71_vm1  ;;  %vm2187_vm9 = vcmp.lt.s32.totalorder %v1361_v57, 16  ;;  %vm61_vm11 = vcmp.ge.s32.totalorder %v1354_v54, 0  ;;  %vm57_vm12 = vcmp.ge.s32.totalorder %v56_v62, 0 }
   0xb   :  { %vm78_vm2 = vcmp.ge.s32.totalorder %v77_v56, 0  ;;  %vm79_vm3 = vcmp.lt.s32.totalorder %v77_v56, 16  ;;  %vm53_vm6 = vcmp.ge.s32.totalorder %v52_v59, 0  ;;  %vm54_vm7 = vcmp.lt.s32.totalorder %v52_v59, 16  ;;  %vm75_vm10 = vmand %vm1368_vm5, %vm2188_vm4 }
   0xc   :  { %vm1373_vm8 = vmand %vm78_vm2, %vm79_vm3  ;;  %vm59_vm0 = vcmp.lt.s32.totalorder %v56_v62, 16  ;;  %vm63_vm1 = vcmp.lt.s32.totalorder %v1354_v54, 16 }
   0xd   :  { %v93_v2 = vld.sshfl [vmem:[#allocation1 + $0x8] sm:$0xff pattern:$0x75316420]  ;;  %v1297_v3 = vld.sshfl [vmem:[#allocation1] sm:$0xff pattern:$0x75316420]  ;;  %vm1383_vm13 = vmand %vm53_vm6, %vm54_vm7 }
   0xe   :  { %v94_v4 = vld.sshfl [vmem:[#allocation1 + $0x10] sm:$0xff pattern:$0x75316420]  ;;  %v1299_v5 = vld.sshfl [vmem:[#allocation1 + $0x18] sm:$0xff pattern:$0x75316420]  ;;  %vm81_vm14 = vmand %vm1373_vm8, %vm57_vm12 }
   0xf   :  { %130 = vst [vmem:[#allocation1 + $0x10] ss:$2 sm:$0xff] %v1293_v1  ;;  %v1010_v6 = vpack.i.bf16 %v94_v4, %v93_v2  ;;  %v1080_v37 = vpack.i.bf16 %v1297_v3, %v1299_v5  ;;  %vm1392_vm15 = vmand %vm75_vm10, %vm2187_vm9  ;;  %v2256_v3 = vmov 0 }
  0x10   :  { %128 = vst [vmem:[#allocation1] ss:$2 sm:$0xff] %v1291_v0  ;;  %vm62_vm2 = vmand %vm1383_vm13, %vm61_vm11 }
  0x11   :  { %1011 = vrot.lane.b32.xlu1 %v1010_v6, %s1228_s0  ;;  %vm1410_vm3 = vmand %vm81_vm14, %vm59_vm0 }
  0x12   :  { %vm58_vm6 = vmand %vm1383_vm13, %vm57_vm12 }
  0x13   :  { %vm64_vm7 = vmand %vm62_vm2, %vm63_vm1 }
  0x14   :  { %vm1431_vm14 = vmand %vm1368_vm5, %vm57_vm12 }
  0x15   :  { %vm60_vm4 = vmand %vm58_vm6, %vm59_vm0 }
  0x16   :  { %v133_v7 = vld.sshfl [vmem:[#allocation1 + $0x10] sm:$0xff pattern:$0x75316420]  ;;  %v134_v8 = vld.sshfl [vmem:[#allocation1 + $0x18] sm:$0xff pattern:$0x75316420]  ;;  %vm83_vm5 = vmand %vm1373_vm8, %vm61_vm11 }
  0x17   :  { %v131_v9 = vld.sshfl [vmem:[#allocation1] sm:$0xff pattern:$0x75316420]  ;;  %167 = vst [vmem:[#allocation1 + $0x10] ss:$2 sm:$0xff] %v1293_v1  ;;  %vm74_vm12 = vmand %vm1431_vm14, %vm59_vm0 }
  0x18   :  { %v1020_v10 = vpack.i.bf16 %v131_v9, %v134_v8  ;;  %v132_v11 = vld.sshfl [vmem:[#allocation1 + $0x8] sm:$0xff pattern:$0x75316420]  ;;  %vm84_vm11 = vmand %vm83_vm5, %vm63_vm1  ;;  %vm2196_vm1 = vcmask 1043456  }
  0x19   :  { %v1015_v12 = vpack.i.bf16 %v133_v7, %v132_v11  ;;  %165 = vst [vmem:[#allocation1] ss:$2 sm:$0xff] %v1291_v0 }
  0x1a   :  { %1021 = vrot.lane.b32.xlu2 %v1020_v10, %s1229_s14 }
  0x1b   :  { %1016 = vrot.lane.b32.xlu1 %v1015_v12, %s1229_s14 }
  0x1e   :  { %v1308_v13 = vld.sshfl [vmem:[#allocation1 + $0x10] sm:$0xff pattern:$0x75316420]  ;;  %v1310_v14 = vld.sshfl [vmem:[#allocation1 + $0x18] sm:$0xff pattern:$0x75316420] }
  0x1f   :  { %204 = vst [vmem:[#allocation1 + $0x10] ss:$2 sm:$0xff] %v1293_v1 }
  0x20   :  { %v1313_v15 = vld.sshfl [vmem:[#allocation1] sm:$0xff pattern:$0x75316420]  ;;  %v169_v16 = vld.sshfl [vmem:[#allocation1 + $0x8] sm:$0xff pattern:$0x75316420] }
  0x21   :  { %202 = vst [vmem:[#allocation1] ss:$2 sm:$0xff] %v1291_v0  ;;  %v1065_v47 = vpack.i.bf16 %v1308_v13, %v169_v16  ;;  %v1085_v49 = vpack.i.bf16 %v1313_v15, %v1310_v14 }
  0x26   :  { %v207_v17 = vld.sshfl [vmem:[#allocation1 + $0x10] sm:$0xff pattern:$0x75316420]  ;;  %v208_v18 = vld.sshfl [vmem:[#allocation1 + $0x18] sm:$0xff pattern:$0x75316420] }
  0x27   :  { %241 = vst [vmem:[#allocation1 + $0x10] ss:$2 sm:$0xff] %v1293_v1 }
  0x28   :  { %v205_v19 = vld.sshfl [vmem:[#allocation1] sm:$0xff pattern:$0x75316420]  ;;  %v206_v20 = vld.sshfl [vmem:[#allocation1 + $0x8] sm:$0xff pattern:$0x75316420] }
  0x29   :  { %v1025_v21 = vpack.i.bf16 %v207_v17, %v206_v20  ;;  %239 = vst [vmem:[#allocation1] ss:$2 sm:$0xff] %v1291_v0  ;;  %v1075_v48 = vpack.i.bf16 %v205_v19, %v208_v18  ;;  %v1448_v19 = vsel %vm64_vm7, 1, %v1236_v50 }
  0x2a   :  { %v153_v61 = vperm.slane %v1448_v19, 0 }
  0x2b   :  { %1026 = vrot.lane.b32.xlu2 %v1025_v21, %s1230_s15 }
  0x2e   :  { %v244_v22 = vld.sshfl [vmem:[#allocation1 + $0x10] sm:$0xff pattern:$0x75316420]  ;;  %v245_v23 = vld.sshfl [vmem:[#allocation1 + $0x18] sm:$0xff pattern:$0x75316420] }
  0x2f   :  { %v1030_v24 = vpack.i.bf16 %v245_v23, %v244_v22  ;;  %278 = vst [vmem:[#allocation1 + $0x10] ss:$2 sm:$0xff] %v1293_v1 }
  0x30   :  { %v242_v25 = vld.sshfl [vmem:[#allocation1] sm:$0xff pattern:$0x75316420]  ;;  %v243_v26 = vld.sshfl [vmem:[#allocation1 + $0x8] sm:$0xff pattern:$0x75316420] }
  0x31   :  { %1031 = vrot.lane.b32.xlu0 %v1030_v24, %s1231_s16  ;;  %276 = vst [vmem:[#allocation1] ss:$2 sm:$0xff] %v1291_v0  ;;  %v1035_v27 = vpack.i.bf16 %v243_v26, %v242_v25 }
  0x33   :  { %1036 = vrot.lane.b32.xlu2 %v1035_v27, %s1231_s16 }
  0x36   :  { %v281_v28 = vld.sshfl [vmem:[#allocation1 + $0x10] sm:$0xff pattern:$0x75316420]  ;;  %v282_v29 = vld.sshfl [vmem:[#allocation1 + $0x18] sm:$0xff pattern:$0x75316420] }
  0x37   :  { %315 = vst [vmem:[#allocation1 + $0x10] ss:$2 sm:$0xff] %v1293_v1  ;;  %v1040_v30 = vpack.i.bf16 %v282_v29, %v281_v28  ;;  %v1467_v28 = vsel %vm60_vm4, 1, %v1236_v50  ;;  %v1474_v29 = vsel %vm1410_vm3, 1, %v1236_v50  ;;  %vm2245_vm3 = vcmp.ge.s32.totalorder %v1361_v57, 0 }
  0x38   :  { %v279_v31 = vld.sshfl [vmem:[#allocation1] sm:$0xff pattern:$0x75316420]  ;;  %v280_v32 = vld.sshfl [vmem:[#allocation1 + $0x8] sm:$0xff pattern:$0x75316420]  ;;  %vm1520_vm6 = vmand %vm1373_vm8, %vm2245_vm3 }
  0x39   :  { %v1045_v33 = vpack.i.bf16 %v280_v32, %v279_v31  ;;  %313 = vst [vmem:[#allocation1] ss:$2 sm:$0xff] %v1291_v0  ;;  %v155_v31 = vperm.slane %v1448_v19, 2  ;;  %v116_v59 = vperm.slane %v1467_v28, 0 }
  0x3b   :  { %1046 = vrot.lane.b32.xlu0 %v1045_v33, %s1232_s17  ;;  %1041 = vrot.lane.b32.xlu2 %v1040_v30, %s1232_s17  ;;  %vm1539_vm8 = vcmp.eq.s32.totalorder %v155_v31, 1 }
  0x3e   :  { %v318_v34 = vld.sshfl [vmem:[#allocation1 + $0x10] sm:$0xff pattern:$0x75316420]  ;;  %v319_v35 = vld.sshfl [vmem:[#allocation1 + $0x18] sm:$0xff pattern:$0x75316420] }
  0x3f   :  { %v1050_v36 = vpack.i.bf16 %v319_v35, %v318_v34  ;;  %352 = vst [vmem:[#allocation1 + $0x10] ss:$2 sm:$0xff] %v1293_v1  ;;  %v2243_v35 = vmov 0 }
  0x40   :  { %v316_v38 = vld.sshfl [vmem:[#allocation1] sm:$0xff pattern:$0x75316420]  ;;  %v317_v39 = vld.sshfl [vmem:[#allocation1 + $0x8] sm:$0xff pattern:$0x75316420] }
  0x41   :  { %1051 = vrot.lane.b32.xlu1 %v1050_v36, %s1233_s18  ;;  %v1055_v40 = vpack.i.bf16 %v317_v39, %v316_v38  ;;  %350 = vst [vmem:[#allocation1] ss:$2 sm:$0xff] %v1291_v0  ;;  %v1495_v36 = vsel %vm74_vm12, 1, %v1236_v50  ;;  %v118_v39 = vperm.slane %v1467_v28, 2 }
  0x42   :  { %v229_v54 = vperm.slane %v1495_v36, 2 }
  0x43   :  { %1056 = vrot.lane.b32.xlu0 %v1055_v40, %s1233_s18  ;;  %1081 = vrot.lane.b32.xlu2 %v1080_v37, %s1228_s0  ;;  %v301_v40 = vperm.slane %v1474_v29, 0  ;;  %vm1548_vm12 = vcmp.eq.s32.totalorder %v118_v39, 1  ;;  %v156_v39 = vperm.slane %v1448_v19, 3 }
  0x44   :  { %v2257_v3 = vsel %vm1548_vm12, 4294967295, %v2256_v3 }
  0x45   :  { %2258 = vst [vmem:[#allocation8_spill] sm:$0xff] %v2257_v3 }
  0x46   :  { %v355_v41 = vld.sshfl [vmem:[#allocation1 + $0x10] sm:$0xff pattern:$0x75316420]  ;;  %v356_v42 = vld.sshfl [vmem:[#allocation1 + $0x18] sm:$0xff pattern:$0x75316420] }
  0x47   :  { %v1060_v43 = vpack.i.bf16 %v356_v42, %v355_v41  ;;  %413 = vst [vmem:[#allocation1 + $0x10] ss:$2 sm:$0xff] %v1293_v1  ;;  %v337_v41 = vsel %vm84_vm11, 1, %v1236_v50  ;;  %v302_v42 = vperm.slane %v1474_v29, 1  ;;  %vm2259_vm11 = vcmp.lt.s32.totalorder %v1361_v57, 16 }
  0x48   :  { %v353_v44 = vld.sshfl [vmem:[#allocation1] sm:$0xff pattern:$0x75316420]  ;;  %v354_v45 = vld.sshfl [vmem:[#allocation1 + $0x8] sm:$0xff pattern:$0x75316420]  ;;  %vm86_vm3 = vmand %vm1520_vm6, %vm2259_vm11 }
  0x49   :  { %v1070_v46 = vpack.i.bf16 %v354_v45, %v353_v44  ;;  %411 = vst [vmem:[#allocation1] ss:$2 sm:$0xff] %v1291_v0  ;;  %v338_v62 = vperm.slane %v337_v41, 0  ;;  %v339_v63 = vperm.slane %v337_v41, 1  ;;  %vm1574_vm11 = vcmp.eq.s32.totalorder %v229_v54, 1 }
  0x4a   :  { %v374_v31 = vsel %vm86_vm3, 1, %v1236_v50  ;;  %vm1600_vm3 = vcmp.eq.s32.totalorder %v116_v59, 1  ;;  %v2268_v54 = vmov 0 }
  0x4b   :  { %1061 = vrot.lane.b32.xlu0 %v1060_v43, %s1234_s19  ;;  %1071 = vrot.lane.b32.xlu1 %v1070_v46, %s1234_s19  ;;  %v2248_v46 = vmov 0  ;;  %v2269_v54 = vsel %vm1600_vm3, 4294967295, %v2268_v54 }
  0x4e   :  { %v1347_v52 = vld.sshfl [vmem:[#allocation1 + $0x10] sm:$0xff pattern:$0x75316420]  ;;  %v1349_v53 = vld.sshfl [vmem:[#allocation1 + $0x18] sm:$0xff pattern:$0x75316420] }
  0x4f   :  { %945 = vst [vmem:[#allocation1 + $0x10] ss:$2 sm:$0xff] %v1293_v1  ;;  %v108_v1 = vlaneseq }
  0x50   :  { %v1399_v5 = vld.sshfl [vmem:[#allocation1] sm:$0xff pattern:$0x75316420]  ;;  %v1401_v6 = vld.sshfl [vmem:[#allocation1 + $0x8] sm:$0xff pattern:$0x75316420] }
  0x51   :  { %v1407_v7 = vand.u32 127, %v108_v1  ;;  %943 = vst [vmem:[#allocation1] ss:$2 sm:$0xff] %v1291_v0  ;;  %v263_v0 = vsel %vm1392_vm15, 1, %v1236_v50  ;;  %v340_v1 = vperm.slane %v337_v41, 2 }
  0x52   :  { %v264_v18 = vperm.slane %v263_v0, 0  ;;  %v265_v23 = vperm.slane %v263_v0, 1  ;;  %v266_v24 = vperm.slane %v263_v0, 2  ;;  %v267_v30 = vperm.slane %v263_v0, 3 }
  0x53   :  { %1066 = vrot.lane.b32.xlu0 %v1065_v47, %s1235_s20  ;;  %1076 = vrot.lane.b32.xlu1 %v1075_v48, %s1230_s15  ;;  %vm2189_vm10 = vcmp.lt.s32.totalorder %v1407_v7, 16  ;;  %vm2190_vm2 = vcmp.lt.s32.totalorder %v1407_v7, 1  ;;  %vm2194_vm9 = vcmp.lt.s32.totalorder %v1407_v7, 127  ;;  %vm2192_vm15 = vcmp.lt.s32.totalorder %v1407_v7, 17 }
  0x54   :  { %vm1490_vm4 = vcmp.eq.s32.totalorder %v264_v18, 1  ;;  %vm2191_vm0 = vcmp.lt.s32.totalorder %v1407_v7, 113  ;;  %vm1526_vm7 = vcmp.eq.s32.totalorder %v265_v23, 1  ;;  %vm1530_vm14 = vcmp.eq.s32.totalorder %v266_v24, 1 }
  0x55   :  { %v2244_v35 = vsel %vm1490_vm4, 4294967295, %v2243_v35  ;;  %v2249_v46 = vsel %vm1526_vm7, 4294967295, %v2248_v46  ;;  %v2250_v47 = vmov 0  ;;  %v303_v48 = vperm.slane %v1474_v29, 2 }
  0x56   :  { %v2251_v47 = vsel %vm1530_vm14, 4294967295, %v2250_v47  ;;  %vm1535_vm5 = vcmp.eq.s32.totalorder %v267_v30, 1  ;;  %v2260_v18 = vmov 0  ;;  %v304_v23 = vperm.slane %v1474_v29, 3 }
  0x57   :  { %vm1570_vm6 = vcmp.eq.s32.totalorder %v303_v48, 1  ;;  %v154_v30 = vperm.slane %v1448_v19, 1 }
  0x58   :  { %v2261_v18 = vsel %vm1570_vm6, 4294967295, %v2260_v18 }
  0x5b   :  { %1086 = vrot.lane.b32.xlu0 %v1085_v49, %s1235_s20  ;;  %v2252_v49 = vmov 0 }
  0x5c   :  { %v2253_v49 = vsel %vm1535_vm5, 4294967295, %v2252_v49 }
  0x74   :  { %v1345_v51 = vpop.permute.xlu2 %1021 }
  0x75   :  { %v1024_v9 = vunpack.i.h.bf16 %v1345_v51  ;;  %v1023_v10 = vunpack.i.l.bf16 %v1345_v51  ;;  %v2254_v51 = vmov 0 }
  0x76   :  { %v2255_v51 = vsel %vm1539_vm8, 4294967295, %v2254_v51 }
  0x77   :  { %v1437_v15 = vsel %vm2189_vm10, %v1023_v10, %v1024_v9 }
  0x83   :  { %v1365_v60 = vpop.permute.xlu1 %1011 }
  0x84   :  { %v2197_v16 = vunpack.i.h.bf16 %v1365_v60  ;;  %v1013_v20 = vunpack.i.l.bf16 %v1365_v60 }
  0x85   :  { %v1363_v58 = vpop.permute.xlu2 %1026 }
  0x86   :  { %v2199_v12 = vunpack.i.h.bf16 %v1363_v58  ;;  %v2200_v13 = vunpack.i.l.bf16 %v1363_v58  ;;  %v1514_v43 = vsel %vm2192_vm15, %v1013_v20, %v2197_v16  ;;  %vm1626_vm15 = vcmp.eq.s32.totalorder %v340_v1, 1 }
  0x88   :  { %v1462_v25 = vsel %vm2190_vm2, %v2200_v13, %v2199_v12  ;;  %vm1587_vm2 = vcmp.eq.s32.totalorder %v153_v61, 1 }
  0x8d   :  { %v1397_v4 = vpop.permute.xlu2 %1036  ;;  %v1017_v11 = vpop.permute.xlu1 %1016 }
  0x8e   :  { %v1019_v17 = vunpack.i.h.bf16 %v1017_v11  ;;  %v1018_v22 = vunpack.i.l.bf16 %v1017_v11  ;;  %v1039_v26 = vunpack.i.h.bf16 %v1397_v4  ;;  %v1038_v27 = vunpack.i.l.bf16 %v1397_v4 }
  0x8f   :  { %v2276_v4 = vmov 0 }
  0x90   :  { %v261_v32 = vsel %vm2194_vm9, %v1038_v27, %v1039_v26  ;;  %v1488_v34 = vsel %vm2189_vm10, %v1019_v17, %v1023_v10  ;;  %v149_v37 = vsel %vm2189_vm10, %v1018_v22, %v1019_v17  ;;  %v1501_v38 = vsel %vm2189_vm10, %v1024_v9, %v1018_v22 }
  0x91   :  { %v272_v45 = vsel %vm1490_vm4, %v261_v32, 0.0  ;;  %v341_v10 = vperm.slane %v337_v41, 3  ;;  %v163_v11 = vsel %vm1539_vm8, %v149_v37, 0.0  ;;  %v2262_v22 = vmov 0 }
  0x92   :  { %v426_v8 = vrot.slane %v272_v45, 4  ;;  %v2263_v22 = vsel %vm1574_vm11, 4294967295, %v2262_v22  ;;  %v126_v32 = vsel %vm1548_vm12, %v1514_v43, 0.0  ;;  %v2265_v37 = vmov 0 }
  0x93   :  { %2264 = vst [vmem:[#allocation9_spill] sm:$0xff] %v2263_v22  ;;  %v2266_v37 = vsel %vm1587_vm2, 4294967295, %v2265_v37  ;;  %v237_v45 = vsel %vm1574_vm11, %v1462_v25, 0.0  ;;  %v393_v48 = vrot.slane %v163_v11, 4  ;;  %v2270_v25 = vmov 0 }
  0x94   :  { %2267 = vst [vmem:[#allocation10_spill] sm:$0xff] %v2266_v37  ;;  %v1620_v59 = vsel %vm2196_vm1, %v1399_v5, %v426_v8  ;;  %vm1622_vm10 = vcmp.eq.s32.totalorder %v339_v63, 1  ;;  %v2272_v11 = vmov 0  ;;  %vm1630_vm11 = vcmp.eq.s32.totalorder %v341_v10, 1 }
  0x95   :  { %v1484_v33 = vpop.permute.xlu2 %1041  ;;  %v2273_v11 = vsel %vm1622_vm10, 4294967295, %v2272_v11  ;;  %v2277_v4 = vsel %vm1630_vm11, 4294967295, %v2276_v4  ;;  %v375_v5 = vperm.slane %v374_v31, 0  ;;  %vm1638_vm1 = vcmp.eq.s32.totalorder %v301_v40, 1 }
  0x96   :  { %v2205_v55 = vunpack.i.h.bf16 %v1484_v33  ;;  %v1043_v56 = vunpack.i.l.bf16 %v1484_v33  ;;  %v161_v63 = vsel %vm1587_vm2, %v1437_v15, 0.0  ;;  %vm2284_vm2 = vcmask 1043456  }
  0x97   :  { %v1662_v12 = vsel %vm2284_vm2, %v126_v32, %v393_v48  ;;  %vm1700_vm8 = vcmp.eq.s32.totalorder %v302_v42, 1  ;;  %vm1704_vm4 = vcmp.eq.s32.totalorder %v304_v23, 1 }
  0x98   :  { %v1562_v9 = vsel %vm2191_vm0, %v1043_v56, %v2205_v55  ;;  %vm1614_vm0 = vcmp.eq.s32.totalorder %v338_v62, 1  ;;  %v2279_v62 = vmov 0 }
  0x99   :  { %v2271_v25 = vsel %vm1614_vm0, 4294967295, %v2270_v25  ;;  %v2280_v62 = vsel %vm1638_vm1, 4294967295, %v2279_v62 }
  0x9d   :  { %v1592_v41 = vpop.permute.xlu2 %1081 }
  0x9e   :  { %v1084_v1 = vunpack.i.h.bf16 %v1592_v41  ;;  %v2204_v8 = vunpack.i.l.bf16 %v1592_v41 }
  0xa3   :  { %v1451_v21 = vpop.permute.xlu0 %1031 }
  0xa4   :  { %v1034_v0 = vunpack.i.h.bf16 %v1451_v21  ;;  %v1033_v14 = vunpack.i.l.bf16 %v1451_v21  ;;  %v2274_v21 = vmov 0 }
  0xa5   :  { %v2275_v21 = vsel %vm1626_vm15, 4294967295, %v2274_v21 }
  0xa6   :  { %v259_v43 = vsel %vm2194_vm9, %v1033_v14, %v1034_v0  ;;  %v260_v19 = vsel %vm2194_vm9, %v1039_v26, %v1033_v14  ;;  %v262_v61 = vsel %vm2194_vm9, %v1034_v0, %v1038_v27  ;;  %vm2278_vm9 = vcmp.ge.s32.totalorder %v1361_v57, 0 }
  0xa7   :  { %vm67_vm12 = vmand %vm1383_vm13, %vm2278_vm9  ;;  %v377_v26 = vperm.slane %v374_v31, 2  ;;  %v376_v27 = vperm.slane %v374_v31, 1  ;;  %v378_v0 = vperm.slane %v374_v31, 3  ;;  %v1647_v14 = vrot.slane %v237_v45, 4 }
  0xa8   :  { %v273_v2 = vsel %vm1526_vm7, %v260_v19, 0.0  ;;  %v274_v40 = vsel %vm1530_vm14, %v259_v43, 0.0  ;;  %v275_v16 = vsel %vm1535_vm5, %v262_v61, 0.0  ;;  %vm2281_vm9 = vcmp.lt.s32.totalorder %v1361_v57, 16 }
  0xa9   :  { %vm1657_vm13 = vmand %vm67_vm12, %vm2281_vm9  ;;  %vm2285_vm7 = vcmp.lt.s32.totalorder %v1407_v7, 17  ;;  %vm1671_vm5 = vcmp.eq.s32.totalorder %v154_v30, 1  ;;  %v2286_v57 = vmov 0  ;;  %vm1677_vm2 = vcmp.eq.s32.totalorder %v377_v26, 1 }
  0xaa   :  { %v1669_v43 = vsel %vm2285_vm7, %v2204_v8, %v1084_v1  ;;  %v2287_v57 = vsel %vm1671_vm5, 4294967295, %v2286_v57  ;;  %vm1681_vm12 = vcmp.eq.s32.totalorder %v375_v5, 1  ;;  %vm1685_vm7 = vcmp.eq.s32.totalorder %v376_v27, 1 }
  0xab   :  { %v427_v30 = vrot.slane %v273_v2, 4  ;;  %v428_v24 = vrot.slane %v274_v40, 4  ;;  %v429_v55 = vrot.slane %v275_v16, 4  ;;  %vm1694_vm9 = vcmp.eq.s32.totalorder %v378_v0, 1 }
  0xac   :  { %v2296_v26 = vmov 0  ;;  %v2298_v5 = vmov 0  ;;  %vm2301_vm14 = vcmp.lt.s32.totalorder %v1407_v7, 112 }
  0xad   :  { %v1568_v17 = vpop.permute.xlu0 %1046  ;;  %v2297_v26 = vsel %vm1700_vm8, 4294967295, %v2296_v26  ;;  %v2299_v5 = vsel %vm1704_vm4, 4294967295, %v2298_v5  ;;  %vm2302_vm6 = vmmov %vm2301_vm14 }
  0xae   :  { %v1049_v19 = vunpack.i.h.bf16 %v1568_v17  ;;  %v1048_v32 = vunpack.i.l.bf16 %v1568_v17  ;;  %v1692_v17 = vsel %vm1657_vm13, 1, %v1236_v50  ;;  %v1711_v50 = vrot.slane %v161_v63, 4  ;;  %vm2303_vm4 = vmmov %vm2302_vm6 }
  0xaf   :  { %vm2300_vm13 = vcmp.lt.s32.totalorder %v1407_v7, 17  ;;  %vm2304_vm8 = vmmov %vm2303_vm4  ;;  %v192_v2 = vperm.slane %v1692_v17, 2 }
  0xb0   :  { %v1717_v27 = vsel %vm2300_vm13, %v1084_v1, %v1013_v20  ;;  %v2306_v1 = vmov 0 }
  0xb3   :  { %v1052_v10 = vpop.permute.xlu1 %1051 }
  0xb4   :  { %v1054_v31 = vunpack.i.h.bf16 %v1052_v10  ;;  %v1053_v45 = vunpack.i.l.bf16 %v1052_v10 }
  0xb5   :  { %v1057_v13 = vpop.permute.xlu0 %1056 }
  0xb6   :  { %v1059_v48 = vunpack.i.h.bf16 %v1057_v13  ;;  %v1058_v61 = vunpack.i.l.bf16 %v1057_v13  ;;  %v2294_v13 = vmov 0  ;;  %v333_v29 = vsel %vm2301_vm14, %v1053_v45, %v1054_v31 }
  0xb7   :  { %v2295_v13 = vsel %vm1694_vm9, 4294967295, %v2294_v13  ;;  %vm2305_vm9 = vcmp.lt.s32.totalorder %v1407_v7, 113  ;;  %vm1733_vm14 = vcmp.eq.s32.totalorder %v156_v39, 1 }
  0xb8   :  { %v334_v42 = vsel %vm2302_vm6, %v1059_v48, %v1053_v45  ;;  %v335_v23 = vsel %vm2303_vm4, %v1058_v61, %v1059_v48  ;;  %v336_v0 = vsel %vm2304_vm8, %v1054_v31, %v1058_v61  ;;  %v298_v63 = vsel %vm2305_vm9, %v1048_v32, %v1049_v19  ;;  %vm2312_vm13 = vmmov %vm2305_vm9 }
  0xb9   :  { %v2307_v1 = vsel %vm1733_vm14, 4294967295, %v2306_v1  ;;  %vm2308_vm6 = vcmask 1043456   ;;  %v228_v45 = vperm.slane %v1495_v36, 1  ;;  %v346_v39 = vsel %vm1614_vm0, %v335_v23, 0.0 }
  0xba   :  { %v1739_v40 = vsel %vm2308_vm6, %v1401_v6, %v427_v30  ;;  %vm2309_vm4 = vmmov %vm2308_vm6  ;;  %v347_v48 = vsel %vm1622_vm10, %v334_v42, 0.0  ;;  %v348_v6 = vsel %vm1626_vm15, %v333_v29, 0.0  ;;  %v349_v61 = vsel %vm1630_vm11, %v336_v0, 0.0 }
  0xbb   :  { %v1743_v15 = vsel %vm2309_vm4, %v1347_v52, %v428_v24  ;;  %vm2310_vm8 = vmmov %vm2309_vm4  ;;  %v2311_v30 = vunpack.i.h.bf16 %v1484_v33  ;;  %v227_v29 = vperm.slane %v1495_v36, 0  ;;  %vm1770_vm4 = vcmp.eq.s32.totalorder %v192_v2, 1 }
  0xbc   :  { %v1747_v31 = vsel %vm2310_vm8, %v1349_v53, %v429_v55  ;;  %v309_v53 = vsel %vm1638_vm1, %v298_v63, 0.0  ;;  %v297_v55 = vsel %vm2305_vm9, %v1049_v19, %v1043_v56  ;;  %v438_v37 = vrot.slane %v346_v39, 4 }
  0xbd   :  { %v1062_v52 = vpop.permute.xlu0 %1061  ;;  %v1072_v24 = vpop.permute.xlu1 %1071  ;;  %v299_v42 = vsel %vm2312_vm13, %v2311_v30, %v1048_v32  ;;  %v439_v22 = vrot.slane %v347_v48, 4  ;;  %v440_v56 = vrot.slane %v348_v6, 4  ;;  %v441_v19 = vrot.slane %v349_v61, 4 }
  0xbe   :  { %v1064_v23 = vunpack.i.h.bf16 %v1062_v52  ;;  %v1063_v0 = vunpack.i.l.bf16 %v1062_v52  ;;  %v1074_v16 = vunpack.i.h.bf16 %v1072_v24  ;;  %v1073_v20 = vunpack.i.l.bf16 %v1072_v24 }
  0xbf   :  { %vm2315_vm8 = vcmp.lt.s32.totalorder %v1407_v7, 111  ;;  %v2319_v2 = vperm.slane %v1467_v28, 1  ;;  %v2320_v24 = vmov 0  ;;  %vm2328_vm11 = vnez %v2299_v5 }
  0xc0   :  { %v370_v33 = vsel %vm2315_vm8, %v1063_v0, %v1064_v23  ;;  %vm2316_vm9 = vmmov %vm2315_vm8  ;;  %vm2329_vm10 = vcmask 1041408  }
  0xc1   :  { %v372_v32 = vsel %vm2316_vm9, %v1073_v20, %v1074_v16  ;;  %vm2317_vm13 = vmmov %vm2315_vm8  ;;  %vm1784_vm3 = vcmp.eq.s32.totalorder %v2319_v2, 1  ;;  %v385_v39 = vsel %vm1677_vm2, %v370_v33, 0.0  ;;  %vm2324_vm9 = vnez %v2297_v26 }
  0xc2   :  { %v371_v30 = vsel %vm2317_vm13, %v1074_v16, %v1063_v0  ;;  %vm2318_vm6 = vmmov %vm2315_vm8  ;;  %v2321_v24 = vsel %vm1784_vm3, 4294967295, %v2320_v24  ;;  %v383_v48 = vsel %vm1681_vm12, %v372_v32, 0.0  ;;  %vm2322_vm8 = vnez %v2295_v13 }
  0xc3   :  { %v373_v52 = vsel %vm2318_vm6, %v1064_v23, %v1073_v20  ;;  %v384_v6 = vsel %vm1685_vm7, %v371_v30, 0.0  ;;  %v473_v61 = vpack.c.bf16 %v385_v39, %v385_v39  ;;  %v471_v20 = vpack.c.bf16 %v383_v48, %v383_v48  ;;  %vm2330_vm0 = vmmov %vm2329_vm10 }
  0xc4   :  { %v386_v16 = vsel %vm2322_vm8, %v373_v52, 0.0  ;;  %v472_v23 = vpack.c.bf16 %v384_v6, %v384_v6  ;;  %vm2323_vm6 = vcmask 1043456   ;;  %v310_v3 = vsel %vm2324_vm9, %v297_v55, 0.0  ;;  %vm2331_vm15 = vmmov %vm2330_vm0 }
  0xc5   :  { %v474_v0 = vpack.c.bf16 %v386_v16, %v386_v16  ;;  %v459_v2 = vsel %vm2323_vm6, %v309_v53, %v438_v37  ;;  %vm2325_vm13 = vnez %v2261_v18  ;;  %vm2327_vm1 = vmmov %vm2323_vm6  ;;  %v312_v30 = vsel %vm2328_vm11, %v299_v42, 0.0  ;;  %v1067_v53 = vpop.permute.xlu0 %1066  ;;  %v1077_v55 = vpop.permute.xlu1 %1076 }
  0xc6   :  { %v2326_v33 = vsel %vm2325_vm13, %v1562_v9, 0.0  ;;  %v488_v52 = vsel %vm2329_vm10, %v473_v61, 0  ;;  %v482_v39 = vsel %vm2330_vm0, %v471_v20, 0  ;;  %v485_v48 = vsel %vm2331_vm15, %v472_v23, 0  ;;  %vm2332_vm8 = vmmov %vm2330_vm0 }
  0xc7   :  { %v461_v32 = vsel %vm2327_vm1, %v2326_v33, %v440_v56  ;;  %v491_v37 = vsel %vm2332_vm8, %v474_v0, 0  ;;  %524 = vmatpush.bf16.msra.mxu2 %v488_v52  ;;  %498 = vmatpush.bf16.msra.mxu0 %v482_v39  ;;  %vm2333_vm6 = vmmov %vm2327_vm1  ;;  %v164_v42 = vsel %vm1733_vm14, %v1488_v34, 0.0  ;;  %v230_v56 = vperm.slane %v1495_v36, 3 }
  0xc8   :  { %v460_v6 = vsel %vm2333_vm6, %v310_v3, %v439_v22  ;;  %vm2334_vm9 = vmmov %vm2327_vm1  ;;  %v1069_v16 = vunpack.i.h.bf16 %v1067_v53  ;;  %v1068_v61 = vunpack.i.l.bf16 %v1067_v53  ;;  %v1079_v20 = vunpack.i.h.bf16 %v1077_v55  ;;  %511 = vmatpush.bf16.msra.mxu1 %v485_v48  ;;  %537 = vmatpush.bf16.msra.mxu3 %v491_v37 }
  0xc9   :  { %v462_v9 = vsel %vm2334_vm9, %v312_v30, %v441_v19  ;;  %v1078_v23 = vunpack.i.l.bf16 %v1077_v55  ;;  %v467_v0 = vpack.c.bf16 %v459_v2, %v1620_v59  ;;  %v469_v33 = vpack.c.bf16 %v461_v32, %v1743_v15 }
  0xca   :  { %vm1818_vm10 = vcmp.eq.s32.totalorder %v227_v29, 1  ;;  %v2335_v3 = vmov 0  ;;  %vm1822_vm15 = vcmp.eq.s32.totalorder %v228_v45, 1  ;;  %v2337_v22 = vmov 0 }
  0xcb   :  { %v2336_v3 = vsel %vm1818_vm10, 4294967295, %v2335_v3  ;;  %v2338_v22 = vsel %vm1822_vm15, 4294967295, %v2337_v22  ;;  %vm2339_vm0 = vcmp.lt.s32.totalorder %v1407_v7, 1  ;;  %v468_v36 = vpack.c.bf16 %v460_v6, %v1739_v40  ;;  %499 = vmatpush.bf16.msra.mxu0 %v467_v0  ;;  %525 = vmatpush.bf16.msra.mxu2 %v469_v33 }
  0xcc   :  { %v225_v34 = vsel %vm2339_vm0, %v1078_v23, %v1079_v20  ;;  %v470_v19 = vpack.c.bf16 %v462_v9, %v1747_v31  ;;  %vm2340_vm1 = vcmp.lt.s32.totalorder %v1407_v7, 15  ;;  %v2341_v15 = vunpack.i.l.bf16 %v1363_v58  ;;  %vm2342_vm8 = vmmov %vm2339_vm0 }
  0xcd   :  { %v186_v59 = vsel %vm2340_vm1, %v1068_v61, %v1069_v16  ;;  %v190_v2 = vperm.slane %v1692_v17, 0  ;;  %v191_v32 = vperm.slane %v1692_v17, 1  ;;  %v2343_v40 = vunpack.i.h.bf16 %v1363_v58  ;;  %vm2344_vm9 = vmmov %vm2339_vm0  ;;  %512 = vmatpush.bf16.msra.mxu1 %v468_v36 }
  0xce   :  { %v224_v29 = vsel %vm2342_vm8, %v1079_v20, %v2341_v15  ;;  %v200_v45 = vsel %vm1770_vm4, %v186_v59, 0.0  ;;  %538 = vmatpush.bf16.msra.mxu3 %v470_v19  ;;  %v193_v52 = vperm.slane %v1692_v17, 3  ;;  %vm1847_vm0 = vcmp.eq.s32.totalorder %v230_v56, 1  ;;  %v1087_v20 = vpop.permute.xlu0 %1086 }
  0xcf   :  { %v222_v31 = vsel %vm2344_vm9, %v2343_v40, %v1078_v23  ;;  %v453_v30 = vsel %vm2333_vm6, %v200_v45, %v1647_v14  ;;  %v2345_v39 = vmov 0  ;;  %v235_v37 = vsel %vm1818_vm10, %v225_v34, 0.0 }
  0xd0   :  { %v2346_v39 = vsel %vm1847_vm0, 4294967295, %v2345_v39  ;;  %v465_v48 = vpack.c.bf16 %v453_v30, %v1662_v12  ;;  %v125_v58 = vsel %vm1784_vm3, %v1717_v27, 0.0  ;;  %v2347_v53 = vsel %vm1671_vm5, %v1501_v38, 0.0  ;;  %v475_v38 = vld [vmem:[%s2180_s3] sm:$0x3] }
  0xd1   :  { %v392_v14 = vrot.slane %v2347_v53, 4  ;;  %v236_v17 = vsel %vm1822_vm15, %v224_v29, 0.0  ;;  %v2348_v55 = vunpack.i.l.bf16 %v1592_v41  ;;  %v2349_v6 = vunpack.i.h.bf16 %v1365_v60 }
  0xd2   :  { %vm2350_vm1 = vcmp.lt.s32.totalorder %v1407_v7, 17  ;;  %v2351_v9 = vperm.slane %v1467_v28, 3  ;;  %v2352_v56 = vmov 0  ;;  %v394_v27 = vrot.slane %v164_v42, 4  ;;  %526 = vmatpush.bf16.msra.mxu2 %v465_v48 }
  0xd3   :  { %v111_v12 = vsel %vm2350_vm1, %v2349_v6, %v2348_v55  ;;  %vm1878_vm6 = vcmp.eq.s32.totalorder %v190_v2, 1  ;;  %vm1882_vm3 = vcmp.eq.s32.totalorder %v191_v32, 1  ;;  %v2356_v60 = vmov 0 }
  0xd4   :  { %vm1871_vm8 = vcmp.eq.s32.totalorder %v2351_v9, 1  ;;  %v2357_v60 = vsel %vm1882_vm3, 4294967295, %v2356_v60  ;;  %v238_v28 = vsel %vm1847_vm0, %v222_v31, 0.0  ;;  %v1089_v23 = vunpack.i.h.bf16 %v1087_v20 }
  0xd5   :  { %v2353_v56 = vsel %vm1871_vm8, 4294967295, %v2352_v56  ;;  %v1088_v42 = vunpack.i.l.bf16 %v1087_v20  ;;  %v403_v0 = vrot.slane %v235_v37, 4  ;;  %vm1888_vm1 = vcmp.eq.s32.totalorder %v193_v52, 1 }
  0xd6   :  { %vm2360_vm9 = vnez %v2269_v54  ;;  %vm2362_vm14 = vcmask 1043456   ;;  %v404_v19 = vrot.slane %v236_v17, 4  ;;  %v127_v59 = vsel %vm1871_vm8, %v111_v12, 0.0 }
  0xd7   :  { %v2361_v34 = vsel %vm2360_vm9, %v1669_v43, 0.0  ;;  %vm2363_vm5 = vcmask 293888   ;;  %vm2364_vm0 = vcmp.lt.s32.totalorder %v1407_v7, 15  ;;  %v406_v2 = vrot.slane %v238_v28, 4 }
  0xd8   :  { %v447_v36 = vsel %vm2362_vm14, %v2361_v34, %v1711_v50  ;;  %993 = vmatmul.msk.bf16.vlgmr.msra.gmra.mxu2 %vm2363_vm5, %v475_v38  ;;  %v188_v15 = vsel %vm2364_vm0, %v1088_v42, %v1089_v23  ;;  %vm2365_vm15 = vmmov %vm2364_vm0  ;;  %v448_v32 = vsel %vm2362_vm14, %v125_v58, %v392_v14 }
  0xd9   :  { %v187_v29 = vsel %vm2365_vm15, %v1089_v23, %v1068_v61  ;;  %vm2366_vm10 = vmmov %vm2364_vm0  ;;  %v198_v43 = vsel %vm1878_vm6, %v188_v15, 0.0 }
  0xda   :  { %v185_v45 = vsel %vm2366_vm10, %v1069_v16, %v1088_v42  ;;  %v199_v50 = vsel %vm1882_vm3, %v187_v29, 0.0  ;;  %vm2367_vm5 = vmmov %vm2362_vm14  ;;  %vm2371_vm10 = vcmask 293888  }
  0xdb   :  { %v201_v40 = vsel %vm1888_vm1, %v185_v45, 0.0  ;;  %v451_v31 = vsel %vm2367_vm5, %v198_v43, %v403_v0  ;;  %vm2368_vm0 = vmmov %vm2367_vm5 }
  0xdc   :  { %v452_v30 = vsel %vm2368_vm0, %v199_v50, %v404_v19  ;;  %vm2369_vm15 = vmmov %vm2368_vm0  ;;  %v463_v52 = vpack.c.bf16 %v451_v31, %v447_v36 }
  0xdd   :  { %v450_v61 = vsel %vm2369_vm15, %v127_v59, %v394_v27  ;;  %vm2370_vm8 = vmmov %vm2368_vm0  ;;  %v464_v48 = vpack.c.bf16 %v452_v30, %v448_v32 }
  0xde   :  { %v454_v16 = vsel %vm2370_vm8, %v201_v40, %v406_v2  ;;  %500 = vmatpush.bf16.msra.mxu0 %v463_v52  ;;  %vm2372_vm14 = vmmov %vm2371_vm10 }
  0xdf   :  { %v466_v37 = vpack.c.bf16 %v454_v16, %v450_v61  ;;  %513 = vmatpush.bf16.msra.mxu1 %v464_v48  ;;  %vm2373_vm3 = vmmov %vm2371_vm10 }
  0xe0   :  { %vm2374_vm5 = vmmov %vm2368_vm0 }
  0xe1   :  { %539 = vmatpush.bf16.msra.mxu3 %v466_v37  ;;  %991 = vmatmul.msk.bf16.vlgmr.msra.gmra.mxu0 %vm2371_vm10, %v475_v38  ;;  %vm2375_vm8 = vmmov %vm2368_vm0 }
  0xe2   :  { %992 = vmatmul.msk.bf16.vlgmr.msra.gmra.mxu1 %vm2372_vm14, %v475_v38  ;;  %vm2376_vm15 = vmmov %vm2368_vm0 }
  0xe3   :  { %vm2377_vm10 = vmmov %vm2368_vm0 }
  0xe4   :  { %994 = vmatmul.msk.bf16.vlgmr.msra.gmra.mxu3 %vm2373_vm3, %v475_v38  ;;  %vm2378_vm14 = vmmov %vm2368_vm0 }
  0xe5   :  { %vm2379_vm3 = vmmov %vm2368_vm0 }
 0x15b   :  { %v528_v58 = vpop.f32.mrf.mxu2 }
 0x15c   :  { %v558_v53 = vmul.f32 %v528_v58, %v528_v58  ;;  %v550_v27 = vsel %vm2368_vm0, %v528_v58, 0.0 }
 0x15e   :  { %v502_v14 = vpop.f32.mrf.mxu0  ;;  %v563_v38 = vsel %vm2378_vm14, %v558_v53, 0.0 }
 0x15f   :  { %v515_v17 = vpop.f32.mrf.mxu1  ;;  %v547_v55 = vsel %vm2374_vm5, %v502_v14, 0.0  ;;  %v556_v6 = vmul.f32 %v502_v14, %v502_v14  ;;  %vm2380_vm5 = vmmov %vm2368_vm0 }
 0x160   :  { %v548_v12 = vsel %vm2375_vm8, %v515_v17, 0.0  ;;  %v557_v9 = vmul.f32 %v515_v17, %v515_v17 }
 0x161   :  { %v549_v20 = vadd.f32 %v548_v12, %v547_v55  ;;  %v560_v28 = vsel %vm2376_vm15, %v556_v6, 0.0 }
 0x162   :  { %v561_v23 = vsel %vm2377_vm10, %v557_v9, 0.0  ;;  %vm2381_vm10 = vcmp.lt.s32.totalorder %v1407_v7, 111 }
 0x163   :  { %v562_v42 = vadd.f32 %v561_v23, %v560_v28  ;;  %v551_v0 = vadd.f32 %v550_v27, %v549_v20  ;;  %v530_v34 = vpop.f32.mrf.mxu2  ;;  %v545_v27 = vld [vmem:[%s2182_s5] sm:$0xf]  ;;  %vm2382_vm14 = vmmov %vm2381_vm10 }
 0x165   :  { %v564_v19 = vadd.f32 %v563_v38, %v562_v42  ;;  %v546_v38 = vld [vmem:[%s2183_s6] sm:$0xf] }
 0x166   :  { %v504_v15 = vpop.f32.mrf.mxu0 }
 0x167   :  { %v541_v36 = vpop.f32.mrf.mxu3  ;;  %v517_v29 = vpop.f32.mrf.mxu1 }
 0x168   :  { %v559_v59 = vmul.f32 %v541_v36, %v541_v36  ;;  %v552_v45 = vsel %vm2379_vm3, %v541_v36, 0.0  ;;  %vm2383_vm3 = vmmov %vm2381_vm10 }
 0x169   :  { %v553_v2 = vadd.f32 %v552_v45, %v551_v0 }
 0x16a   :  { %v565_v43 = vsel %vm2380_vm5, %v559_v59, 0.0  ;;  %vm2384_vm5 = vmmov %vm2383_vm3 }
 0x16b   :  { %554 = vadd.xlane.f32.xlu1 %v553_v2  ;;  %v566_v50 = vadd.f32 %v565_v43, %v564_v19 }
 0x16d   :  { %567 = vadd.xlane.f32.xlu2 %v566_v50 }
 0x16f   :  { %v543_v32 = vpop.f32.mrf.mxu3 }
 0x1de   :  { %v555_v40 = vpop.xlane.xlu1 %554 }
 0x1df   :  { %v569_v31 = vmul.f32 0.001953125, %v555_v40 }
 0x1e0   :  { %v568_v30 = vpop.xlane.xlu2 %567 }
 0x1e1   :  { %v571_v61 = vmul.f32 %v569_v31, %v569_v31  ;;  %v570_v16 = vmul.f32 0.001953125, %v568_v30 }
 0x1e3   :  { %v572_v52 = vsub.f32 %v570_v16, %v571_v61 }
 0x1e5   :  { %v573_v48 = vmax.f32 %v572_v52, 0.0 }
 0x1e7   :  { %v574_v37 = vadd.f32 1e-05, %v573_v48 }
 0x1e9   :  { %1171 = vrsqrt.f32 %v574_v37  ;;  %vm581_vm0 = vweird.f32 %v574_v37 }
 0x1ef   :  { %v1172_v53 = vpop.eup %1171 }
 0x1f0   :  { %v576_v55 = vmul.f32 %v1172_v53, %v574_v37  ;;  %vm582_vm8 = vweird.f32 %v1172_v53 }
 0x1f1   :  { %vm583_vm15 = vmor %vm581_vm0, %vm582_vm8  ;;  %vm2385_vm8 = vnez %v2295_v13 }
 0x1f2   :  { %v577_v6 = vmul.f32 %v1172_v53, %v576_v55 }
 0x1f4   :  { %v578_v12 = vmul.f32 0.5, %v577_v6 }
 0x1f6   :  { %v579_v9 = vsub.f32 1.5, %v578_v12 }
 0x1f8   :  { %v580_v20 = vmul.f32 %v1172_v53, %v579_v9 }
 0x1fa   :  { %v584_v28 = vsel %vm583_vm15, %v1172_v53, %v580_v20 }
 0x1fb   :  { %v585_v23 = vmul.f32 %v584_v28, %v545_v27 }
 0x1fd   :  { %590 = vperm.xlu0 %1090, %v585_v23   ;;  %v586_v42 = vmul.f32 %v585_v23, %v569_v31 }
 0x1ff   :  { %v587_v0 = vsub.f32 %v546_v38, %v586_v42 }
 0x205   :  { %599 = vperm.xlu0 %1090, %v587_v0  }
 0x26f   :  { %v591_v34 = vpop.permute.xlu0 %590 }
 0x270   :  { %v593_v19 = vmul.f32 %v591_v34, %v502_v14  ;;  %v594_v59 = vmul.f32 %v591_v34, %v515_v17  ;;  %v595_v15 = vmul.f32 %v591_v34, %v528_v58  ;;  %v596_v29 = vmul.f32 %v591_v34, %v541_v36 }
 0x277   :  { %v600_v45 = vpop.permute.xlu0 %599 }
 0x278   :  { %v602_v2 = vadd.f32 %v600_v45, %v593_v19  ;;  %v603_v43 = vadd.f32 %v600_v45, %v594_v59  ;;  %v604_v50 = vadd.f32 %v600_v45, %v595_v15  ;;  %v605_v32 = vadd.f32 %v600_v45, %v596_v29 }
 0x27a   :  { %v1935_v40 = vmax.f32 %v602_v2, 0.0  ;;  %v1937_v30 = vmax.f32 %v603_v43, 0.0  ;;  %v1939_v31 = vmax.f32 %v604_v50, 0.0  ;;  %v1941_v61 = vmax.f32 %v605_v32, 0.0 }
 0x27c   :  { %v1101_v16 = vpack.i.bf16 %v1941_v61, %v1939_v31  ;;  %v1106_v58 = vpack.i.bf16 %v1937_v30, %v1935_v40  ;;  %v1126_v14 = vpack.i.bf16 %v1939_v31, %v1937_v30  ;;  %v1146_v17 = vpack.i.bf16 %v1935_v40, %v1941_v61 }
 0x27e   :  { %1102 = vrot.lane.b32.xlu2 %v1101_v16, %s1233_s18  ;;  %1092 = vrot.lane.b32.xlu0 %v1101_v16, %s1234_s19 }
 0x27f   :  { %1107 = vrot.lane.b32.xlu1 %v1106_v58, %s1234_s19 }
 0x286   :  { %1097 = vrot.lane.b32.xlu0 %v1101_v16, %s1231_s16  ;;  %1127 = vrot.lane.b32.xlu2 %v1126_v14, %s1229_s14 }
 0x287   :  { %1132 = vrot.lane.b32.xlu1 %v1126_v14, %s1230_s15 }
 0x28e   :  { %1142 = vrot.lane.b32.xlu2 %v1126_v14, %s1228_s0  ;;  %1112 = vrot.lane.b32.xlu0 %v1106_v58, %s1231_s16 }
 0x28f   :  { %1147 = vrot.lane.b32.xlu1 %v1146_v17, %s1229_s14 }
 0x296   :  { %1157 = vrot.lane.b32.xlu2 %v1146_v17, %s1230_s15  ;;  %1117 = vrot.lane.b32.xlu0 %v1101_v16, %s1232_s17 }
 0x297   :  { %1162 = vrot.lane.b32.xlu1 %v1146_v17, %s1228_s0 }
 0x29e   :  { %1122 = vrot.lane.b32.xlu0 %v1106_v58, %s1233_s18 }
 0x2a6   :  { %1137 = vrot.lane.b32.xlu0 %v1106_v58, %s1232_s17 }
 0x2ae   :  { %1152 = vrot.lane.b32.xlu0 %v1126_v14, %s1235_s20 }
 0x2b6   :  { %1167 = vrot.lane.b32.xlu0 %v1146_v17, %s1235_s20 }
 0x2d8   :  { %v1103_v59 = vpop.permute.xlu2 %1102 }
 0x2d9   :  { %v1105_v43 = vunpack.i.h.bf16 %v1103_v59  ;;  %v1104_v50 = vunpack.i.l.bf16 %v1103_v59 }
 0x2e0   :  { %v1987_v32 = vpop.permute.xlu2 %1127 }
 0x2f0   :  { %v1093_v36 = vpop.permute.xlu0 %1092 }
 0x2f1   :  { %v1095_v52 = vunpack.i.h.bf16 %v1093_v36  ;;  %v1094_v48 = vunpack.i.l.bf16 %v1093_v36  ;;  %v1108_v37 = vpop.permute.xlu1 %1107 }
 0x2f2   :  { %v1110_v53 = vunpack.i.h.bf16 %v1108_v37  ;;  %v1109_v55 = vunpack.i.l.bf16 %v1108_v37 }
 0x2f3   :  { %v730_v6 = vsel %vm2381_vm10, %v1094_v48, %v1095_v52 }
 0x2f4   :  { %v736_v12 = vsel %vm1677_vm2, %v730_v6, 0.0  ;;  %v732_v9 = vsel %vm2382_vm14, %v1109_v55, %v1110_v53  ;;  %v731_v27 = vsel %vm2383_vm3, %v1110_v53, %v1094_v48  ;;  %v733_v20 = vsel %vm2384_vm5, %v1095_v52, %v1109_v55 }
 0x2f5   :  { %v812_v28 = vpack.c.bf16 %v736_v12, %v736_v12  ;;  %v734_v23 = vsel %vm1681_vm12, %v732_v9, 0.0  ;;  %v735_v42 = vsel %vm1685_vm7, %v731_v27, 0.0  ;;  %v737_v10 = vsel %vm2385_vm8, %v733_v20, 0.0  ;;  %v2001_v12 = vpop.permute.xlu2 %1142 }
 0x2f6   :  { %v810_v38 = vpack.c.bf16 %v734_v23, %v734_v23  ;;  %v811_v0 = vpack.c.bf16 %v735_v42, %v735_v42  ;;  %v813_v34 = vpack.c.bf16 %v737_v10, %v737_v10  ;;  %vm2386_vm2 = vcmask 1041408  }
 0x2f7   :  { %v825_v19 = vsel %vm2386_vm2, %v812_v28, 0  ;;  %vm2387_vm0 = vmmov %vm2386_vm2  ;;  %vm2390_vm12 = vcmp.lt.s32.totalorder %v1407_v7, 127  ;;  %vm2391_vm7 = vcmp.lt.s32.totalorder %v1407_v7, 112  ;;  %vm2392_vm14 = vnez %v2251_v47 }
 0x2f8   :  { %v1098_v15 = vpop.permute.xlu0 %1097  ;;  %861 = vmatpush.bf16.msrb.mxu2 %v825_v19  ;;  %v819_v29 = vsel %vm2387_vm0, %v810_v38, 0  ;;  %vm2388_vm15 = vmmov %vm2387_vm0  ;;  %v714_v58 = vsel %vm2391_vm7, %v1104_v50, %v1105_v43  ;;  %vm2393_vm3 = vnez %v2275_v21  ;;  %vm2394_vm5 = vcmp.lt.s32.totalorder %v1407_v7, 113 }
 0x2f9   :  { %v822_v45 = vsel %vm2388_vm15, %v811_v0, 0  ;;  %vm2389_vm10 = vmmov %vm2387_vm0  ;;  %835 = vmatpush.bf16.msrb.mxu0 %v819_v29  ;;  %v1100_v8 = vunpack.i.h.bf16 %v1098_v15  ;;  %v1099_v13 = vunpack.i.l.bf16 %v1098_v15  ;;  %v720_v36 = vsel %vm2393_vm3, %v714_v58, 0.0  ;;  %v1997_v53 = vpop.permute.xlu1 %1132 }
 0x2fa   :  { %v828_v44 = vsel %vm2389_vm10, %v813_v34, 0  ;;  %848 = vmatpush.bf16.msrb.mxu1 %v822_v45  ;;  %v780_v6 = vrot.slane %v720_v36, 4  ;;  %vm2395_vm8 = vcmask 1043456   ;;  %vm2397_vm0 = vmmov %vm2390_vm12  ;;  %v1130_v10 = vunpack.i.h.bf16 %v1987_v32 }
 0x2fb   :  { %874 = vmatpush.bf16.msrb.mxu3 %v828_v44  ;;  %v682_v16 = vsel %vm2390_vm12, %v1099_v13, %v1100_v8  ;;  %vm2396_vm2 = vmmov %vm2395_vm8  ;;  %v1129_v38 = vunpack.i.l.bf16 %v1987_v32  ;;  %vm2400_vm10 = vnez %v2244_v35  ;;  %v1145_v59 = vunpack.i.h.bf16 %v2001_v12 }
 0x2fc   :  { %v688_v14 = vsel %vm2392_vm14, %v682_v16, 0.0  ;;  %vm2398_vm15 = vmmov %vm2397_vm0  ;;  %v1144_v15 = vunpack.i.l.bf16 %v2001_v12  ;;  %vm2402_vm14 = vcmp.lt.s32.totalorder %v1407_v7, 16  ;;  %v1135_v16 = vunpack.i.h.bf16 %v1997_v53 }
 0x2fd   :  { %v768_v37 = vrot.slane %v688_v14, 4  ;;  %vm2401_vm12 = vmmov %vm2391_vm7  ;;  %v635_v35 = vsel %vm2402_vm14, %v1129_v38, %v1130_v10  ;;  %vm2413_vm14 = vcmp.lt.s32.totalorder %v1407_v7, 113 }
 0x2fe   :  { %vm2403_vm3 = vmmov %vm2391_vm7 }
 0x2ff   :  { %v796_v21 = vsel %vm2395_vm8, %v1939_v31, %v768_v37  ;;  %vm2405_vm8 = vnez %v2253_v49 }
 0x300   :  { %v1113_v2 = vpop.permute.xlu0 %1112 }
 0x301   :  { %v1115_v9 = vunpack.i.h.bf16 %v1113_v2  ;;  %v1114_v27 = vunpack.i.l.bf16 %v1113_v2  ;;  %v2020_v29 = vpop.permute.xlu1 %1147  ;;  %v1158_v2 = vpop.permute.xlu2 %1157 }
 0x303   :  { %v684_v23 = vsel %vm2397_vm0, %v1114_v27, %v1115_v9  ;;  %v683_v18 = vsel %vm2398_vm15, %v1115_v9, %v1099_v13  ;;  %vm2408_vm15 = vnez %v2277_v4 }
 0x304   :  { %v686_v19 = vsel %vm2400_vm10, %v684_v23, 0.0  ;;  %vm2410_vm10 = vnez %v2255_v51 }
 0x305   :  { %v766_v58 = vrot.slane %v686_v19, 4  ;;  %v640_v49 = vsel %vm2410_vm10, %v635_v35, 0.0  ;;  %v2423_v35 = vld [vmem:[#allocation8_spill] sm:$0xff] }
 0x308   :  { %v1118_v17 = vpop.permute.xlu0 %1117 }
 0x309   :  { %v1120_v52 = vunpack.i.h.bf16 %v1118_v17  ;;  %v1119_v48 = vunpack.i.l.bf16 %v1118_v17 }
 0x30b   :  { %v698_v55 = vsel %vm2394_vm5, %v1119_v48, %v1120_v52  ;;  %vm2404_vm5 = vnez %v2249_v46 }
 0x30c   :  { %v704_v47 = vsel %vm2325_vm13, %v698_v55, 0.0  ;;  %vm2399_vm13 = vmmov %vm2397_vm0  ;;  %v687_v13 = vsel %vm2404_vm5, %v683_v18, 0.0  ;;  %vm2407_vm0 = vnez %v2273_v11 }
 0x30d   :  { %v800_v20 = vsel %vm2396_vm2, %v704_v47, %v780_v6  ;;  %v685_v31 = vsel %vm2399_vm13, %v1100_v8, %v1114_v27  ;;  %vm2406_vm2 = vnez %v2271_v25  ;;  %vm2409_vm13 = vcmp.lt.s32.totalorder %v1407_v7, 17 }
 0x30e   :  { %v808_v28 = vpack.c.bf16 %v800_v20, %v796_v21  ;;  %v689_v14 = vsel %vm2405_vm8, %v685_v31, 0.0  ;;  %v1160_v25 = vunpack.i.h.bf16 %v1158_v2  ;;  %vm2416_vm8 = vnez %v2280_v62  ;;  %v1163_v31 = vpop.permute.xlu1 %1162 }
 0x30f   :  { %v769_v11 = vrot.slane %v689_v14, 4  ;;  %v1159_v62 = vunpack.i.l.bf16 %v1158_v2  ;;  %v1165_v14 = vunpack.i.h.bf16 %v1163_v31  ;;  %v1164_v2 = vunpack.i.l.bf16 %v1163_v31 }
 0x310   :  { %v1123_v42 = vpop.permute.xlu0 %1122  ;;  %862 = vmatpush.bf16.msrb.mxu2 %v808_v28 }
 0x311   :  { %v1125_v0 = vunpack.i.h.bf16 %v1123_v42  ;;  %v1124_v34 = vunpack.i.l.bf16 %v1123_v42 }
 0x313   :  { %v715_v45 = vsel %vm2401_vm12, %v1125_v0, %v1104_v50  ;;  %v716_v44 = vsel %vm2391_vm7, %v1124_v34, %v1125_v0  ;;  %v717_v8 = vsel %vm2403_vm3, %v1105_v43, %v1124_v34  ;;  %v1134_v50 = vunpack.i.l.bf16 %v1997_v53  ;;  %vm2414_vm3 = vmmov %vm2413_vm14 }
 0x314   :  { %v718_v17 = vsel %vm2406_vm2, %v716_v44, 0.0  ;;  %v719_v36 = vsel %vm2407_vm0, %v715_v45, 0.0  ;;  %v767_v43 = vrot.slane %v687_v13, 4  ;;  %v721_v46 = vsel %vm2408_vm15, %v717_v8, 0.0  ;;  %vm2415_vm5 = vmmov %vm2414_vm3  ;;  %v2425_v13 = vld [vmem:[#allocation9_spill] sm:$0xff] }
 0x315   :  { %v619_v53 = vsel %vm2409_vm13, %v1144_v15, %v1145_v59  ;;  %vm2411_vm12 = vcmp.lt.s32.totalorder %v1407_v7, 1  ;;  %v778_v27 = vrot.slane %v718_v17, 4  ;;  %vm2412_vm7 = vcmask 1043456  }
 0x316   :  { %v667_v9 = vsel %vm2411_vm12, %v1134_v50, %v1135_v16  ;;  %v794_v4 = vsel %vm2412_vm7, %v1935_v40, %v766_v58  ;;  %v779_v47 = vrot.slane %v719_v36, 4  ;;  %v781_v28 = vrot.slane %v721_v46, 4  ;;  %vm2418_vm0 = vmmov %vm2412_vm7 }
 0x317   :  { %vm2417_vm2 = vnez %v2297_v26  ;;  %v795_v40 = vsel %vm2418_vm0, %v1937_v30, %v767_v43  ;;  %vm2419_vm15 = vmmov %vm2418_vm0  ;;  %v1150_v44 = vunpack.i.h.bf16 %v2020_v29  ;;  %v1149_v30 = vunpack.i.l.bf16 %v2020_v29 }
 0x318   :  { %v1138_v37 = vpop.permute.xlu0 %1137  ;;  %vm2420_vm13 = vmmov %vm2418_vm0  ;;  %vm2426_vm7 = vnez %v2425_v13  ;;  %v744_v58 = vrot.slane %v640_v49, 4 }
 0x319   :  { %v1140_v55 = vunpack.i.h.bf16 %v1138_v37  ;;  %v1139_v6 = vunpack.i.l.bf16 %v1138_v37  ;;  %vm2421_vm10 = vmmov %vm2418_vm0 }
 0x31a   :  { %vm2422_vm12 = vmmov %vm2418_vm0 }
 0x31b   :  { %v700_v21 = vsel %vm2413_vm14, %v1139_v6, %v1140_v55  ;;  %v699_v20 = vsel %vm2414_vm3, %v1140_v55, %v1119_v48  ;;  %v701_v51 = vsel %vm2415_vm5, %v1120_v52, %v1139_v6  ;;  %v797_v52 = vsel %vm2421_vm10, %v1941_v61, %v769_v11 }
 0x31c   :  { %v702_v23 = vsel %vm2416_vm8, %v700_v21, 0.0  ;;  %v703_v42 = vsel %vm2417_vm2, %v699_v20, 0.0  ;;  %v705_v0 = vsel %vm2328_vm11, %v701_v51, 0.0  ;;  %vm2424_vm11 = vnez %v2423_v35  ;;  %vm2431_vm2 = vmmov %vm2418_vm0 }
 0x31d   :  { %v798_v34 = vsel %vm2419_vm15, %v702_v23, %v778_v27  ;;  %v799_v48 = vsel %vm2420_vm13, %v703_v42, %v779_v47  ;;  %v801_v18 = vsel %vm2422_vm12, %v705_v0, %v781_v28  ;;  %v624_v8 = vsel %vm2424_vm11, %v619_v53, 0.0  ;;  %vm2435_vm10 = vmmov %vm2431_vm2 }
 0x31e   :  { %v806_v19 = vpack.c.bf16 %v798_v34, %v794_v4  ;;  %v807_v26 = vpack.c.bf16 %v799_v48, %v795_v40  ;;  %v809_v45 = vpack.c.bf16 %v801_v18, %v797_v52  ;;  %v672_v61 = vsel %vm2426_vm7, %v667_v9, 0.0  ;;  %v2439_v4 = vld [vmem:[#allocation10_spill] sm:$0xff] }
 0x31f   :  { %vm2427_vm14 = vcmp.lt.s32.totalorder %v1407_v7, 1  ;;  %vm2429_vm5 = vcmp.lt.s32.totalorder %v1407_v7, 16  ;;  %vm2430_vm8 = vcmp.lt.s32.totalorder %v1407_v7, 15  ;;  %v756_v53 = vrot.slane %v672_v61, 4 }
 0x320   :  { %v1153_v5 = vpop.permute.xlu0 %1152  ;;  %836 = vmatpush.bf16.msrb.mxu0 %v806_v19  ;;  %849 = vmatpush.bf16.msrb.mxu1 %v807_v26  ;;  %v669_v37 = vsel %vm2427_vm14, %v1159_v62, %v1160_v25  ;;  %vm2428_vm3 = vmmov %vm2427_vm14  ;;  %v637_v43 = vsel %vm2429_vm5, %v1149_v30, %v1150_v44  ;;  %v788_v49 = vsel %vm2431_vm2, %v624_v8, %v744_v58  ;;  %vm2436_vm12 = vcmp.lt.s32.totalorder %v1407_v7, 17 }
 0x321   :  { %v1155_v17 = vunpack.i.h.bf16 %v1153_v5  ;;  %v1154_v36 = vunpack.i.l.bf16 %v1153_v5  ;;  %875 = vmatpush.bf16.msrb.mxu3 %v809_v45  ;;  %v668_v29 = vsel %vm2428_vm3, %v1160_v25, %v1134_v50  ;;  %vm2432_vm0 = vmmov %vm2428_vm3  ;;  %v621_v9 = vsel %vm2436_vm12, %v1164_v2, %v1165_v14 }
 0x322   :  { %v666_v55 = vsel %vm2432_vm0, %v1135_v16, %v1159_v62  ;;  %vm2433_vm15 = vmmov %vm2429_vm5  ;;  %vm2437_vm11 = vnez %v2336_v3  ;;  %vm2438_vm7 = vnez %v2338_v22  ;;  %vm2440_vm14 = vnez %v2439_v4 }
 0x323   :  { %v651_v46 = vsel %vm2430_vm8, %v1154_v36, %v1155_v17  ;;  %v636_v6 = vsel %vm2433_vm15, %v1150_v44, %v1129_v38  ;;  %vm2434_vm13 = vmmov %vm2429_vm5  ;;  %v670_v16 = vsel %vm2437_vm11, %v669_v37, 0.0  ;;  %v671_v27 = vsel %vm2438_vm7, %v668_v29, 0.0 }
 0x324   :  { %v634_v50 = vsel %vm2434_vm13, %v1130_v10, %v1149_v30  ;;  %v656_v25 = vsel %vm1770_vm4, %v651_v46, 0.0  ;;  %v638_v32 = vsel %vm2440_vm14, %v637_v43, 0.0  ;;  %vm2441_vm3 = vmmov %vm2436_vm12  ;;  %vm2442_vm4 = vnez %v2287_v57 }
 0x325   :  { %v792_v11 = vsel %vm2435_vm10, %v656_v25, %v756_v53  ;;  %v620_v63 = vsel %vm2441_vm3, %v1165_v14, %v1144_v15  ;;  %v639_v10 = vsel %vm2442_vm4, %v636_v6, 0.0  ;;  %vm2443_vm5 = vmmov %vm2441_vm3  ;;  %vm2444_vm8 = vnez %v2307_v1  ;;  %v814_v15 = vld [vmem:[%s2181_s4] sm:$0x3] }
 0x326   :  { %v804_v38 = vpack.c.bf16 %v792_v11, %v788_v49  ;;  %v618_v3 = vsel %vm2443_vm5, %v1145_v59, %v1164_v2  ;;  %v641_v22 = vsel %vm2444_vm8, %v634_v50, 0.0  ;;  %vm2445_vm2 = vnez %v2346_v39 }
 0x327   :  { %v673_v47 = vsel %vm2445_vm2, %v666_v55, 0.0  ;;  %v622_v57 = vsel %vm2360_vm9, %v621_v9, 0.0  ;;  %v754_v20 = vrot.slane %v670_v16, 4  ;;  %v755_v12 = vrot.slane %v671_v27, 4 }
 0x328   :  { %v1168_v21 = vpop.permute.xlu0 %1167  ;;  %863 = vmatpush.bf16.msrb.mxu2 %v804_v38  ;;  %v742_v59 = vrot.slane %v638_v32, 4  ;;  %vm2446_vm0 = vnez %v2321_v24  ;;  %v743_v23 = vrot.slane %v639_v10, 4  ;;  %vm2447_vm15 = vnez %v2353_v56 }
 0x329   :  { %v1170_v51 = vunpack.i.h.bf16 %v1168_v21  ;;  %v1169_v28 = vunpack.i.l.bf16 %v1168_v21  ;;  %v623_v1 = vsel %vm2446_vm0, %v620_v63, 0.0  ;;  %v625_v39 = vsel %vm2447_vm15, %v618_v3, 0.0 }
 0x32a   :  { %v745_v42 = vrot.slane %v641_v22, 4  ;;  %v757_v40 = vrot.slane %v673_v47, 4  ;;  %vm2448_vm13 = vcmask 293888   ;;  %vm2449_vm10 = vcmp.lt.s32.totalorder %v1407_v7, 15 }
 0x32b   :  { %997 = vmatmul.msk.bf16.vlgmr.msrb.gmra.mxu2 %vm2448_vm13, %v814_v15  ;;  %v653_v54 = vsel %vm2449_vm10, %v1169_v28, %v1170_v51  ;;  %vm2450_vm9 = vcmask 1043456   ;;  %vm2451_vm12 = vmmov %vm2449_vm10  ;;  %vm2453_vm7 = vnez %v2357_v60 }
 0x32c   :  { %v786_v0 = vsel %vm2450_vm9, %v622_v57, %v742_v59  ;;  %v652_v34 = vsel %vm2451_vm12, %v1170_v51, %v1154_v36  ;;  %vm2452_vm11 = vmmov %vm2449_vm10  ;;  %v654_v48 = vsel %vm1878_vm6, %v653_v54, 0.0 }
 0x32d   :  { %v650_v24 = vsel %vm2452_vm11, %v1155_v17, %v1169_v28  ;;  %v655_v56 = vsel %vm2453_vm7, %v652_v34, 0.0  ;;  %vm2454_vm14 = vmmov %vm2450_vm9  ;;  %v946_v34 = vld.sshfl [vmem:[#allocation1] sm:$0xff pattern:$0x75316420] }
 0x32e   :  { %v787_v52 = vsel %vm2454_vm14, %v623_v1, %v743_v23  ;;  %v657_v18 = vsel %vm1888_vm1, %v650_v24, 0.0  ;;  %vm2455_vm3 = vmmov %vm2450_vm9  ;;  %v883_v1 = vld [vmem:[%s2185_s8] sm:$0xf]  ;;  %v947_v24 = vld.sshfl [vmem:[#allocation1 + $0x8] sm:$0xff pattern:$0x75316420] }
 0x32f   :  { %v790_v62 = vsel %vm2455_vm3, %v654_v48, %v754_v20  ;;  %vm2456_vm4 = vmmov %vm2455_vm3  ;;  %v882_v20 = vld [vmem:[%s2184_s7] sm:$0xf]  ;;  %v948_v48 = vld.sshfl [vmem:[#allocation1 + $0x10] sm:$0xff pattern:$0x75316420]  ;;  %s1237_s7 = smov [#allocation5]  }
 0x330   :  { %v791_v31 = vsel %vm2456_vm4, %v655_v56, %v755_v12  ;;  %vm2457_vm5 = vmmov %vm2455_vm3  ;;  %v802_v26 = vpack.c.bf16 %v790_v62, %v786_v0  ;;  %v949_v56 = vld.sshfl [vmem:[#allocation1 + $0x18] sm:$0xff pattern:$0x75316420]  ;;  %s979_s8 = sshll.u32 %s1237_s7, 4  ;;  %s980_s8 = int_to_ptr.vmem [resolvable:$true] %s979_s8 }
 0x331   :  { %v789_v19 = vsel %vm2457_vm5, %v625_v39, %v745_v42  ;;  %vm2458_vm8 = vmmov %vm2455_vm3  ;;  %v803_v45 = vpack.c.bf16 %v791_v31, %v787_v52 }
 0x332   :  { %v793_v7 = vsel %vm2458_vm8, %v657_v18, %v757_v40  ;;  %837 = vmatpush.bf16.msrb.mxu0 %v802_v26  ;;  %vm2459_vm6 = vmmov %vm2448_vm13 }
 0x333   :  { %v805_v41 = vpack.c.bf16 %v793_v7, %v789_v19  ;;  %850 = vmatpush.bf16.msrb.mxu1 %v803_v45  ;;  %vm2460_vm2 = vmmov %vm2459_vm6 }
 0x334   :  { %vm2461_vm0 = vmmov %vm2460_vm2 }
 0x335   :  { %876 = vmatpush.bf16.msrb.mxu3 %v805_v41  ;;  %995 = vmatmul.msk.bf16.vlgmr.msrb.gmra.mxu0 %vm2459_vm6, %v814_v15  ;;  %vm2462_vm1 = vmmov %vm2455_vm3 }
 0x336   :  { %996 = vmatmul.msk.bf16.vlgmr.msrb.gmra.mxu1 %vm2460_vm2, %v814_v15  ;;  %vm2463_vm15 = vmmov %vm2462_vm1 }
 0x337   :  { %vm2464_vm13 = vmmov %vm2462_vm1 }
 0x338   :  { %998 = vmatmul.msk.bf16.vlgmr.msrb.gmra.mxu3 %vm2461_vm0, %v814_v15  ;;  %vm2465_vm10 = vmmov %vm2462_vm1 }
 0x339   :  { %vm2466_vm9 = vmmov %vm2462_vm1 }
 0x33a   :  { %vm2467_vm12 = vmmov %vm2462_vm1 }
 0x33b   :  { %vm2468_vm11 = vmmov %vm2462_vm1 }
 0x33c   :  { %vm2469_vm7 = vmmov %vm2462_vm1 }
 0x33d   :  { %vm2470_vm5 = vmmov %vm2462_vm1 }
 0x33e   :  { %vm2471_vm8 = vmmov %vm2462_vm1 }
 0x3ae   :  { %v865_v60 = vpop.f32.mrf.mxu2 }
 0x3af   :  { %v895_v33 = vmul.f32 %v865_v60, %v865_v60  ;;  %v887_v61 = vsel %vm2464_vm13, %v865_v60, 0.0 }
 0x3b1   :  { %v900_v36 = vsel %vm2467_vm12, %v895_v33, 0.0 }
 0x3b2   :  { %v839_v44 = vpop.f32.mrf.mxu0 }
 0x3b3   :  { %v852_v30 = vpop.f32.mrf.mxu1  ;;  %v884_v5 = vsel %vm2462_vm1, %v839_v44, 0.0  ;;  %v893_v35 = vmul.f32 %v839_v44, %v839_v44 }
 0x3b4   :  { %v885_v8 = vsel %vm2463_vm15, %v852_v30, 0.0  ;;  %v894_v13 = vmul.f32 %v852_v30, %v852_v30 }
 0x3b5   :  { %v886_v58 = vadd.f32 %v885_v8, %v884_v5  ;;  %v897_v14 = vsel %vm2465_vm10, %v893_v35, 0.0 }
 0x3b6   :  { %v898_v2 = vsel %vm2466_vm9, %v894_v13, 0.0  ;;  %v867_v29 = vpop.f32.mrf.mxu2 }
 0x3b7   :  { %v899_v17 = vadd.f32 %v898_v2, %v897_v14  ;;  %v888_v37 = vadd.f32 %v887_v61, %v886_v58 }
 0x3b9   :  { %v901_v46 = vadd.f32 %v900_v36, %v899_v17 }
 0x3ba   :  { %v841_v49 = vpop.f32.mrf.mxu0 }
 0x3bb   :  { %v878_v43 = vpop.f32.mrf.mxu3  ;;  %v854_v55 = vpop.f32.mrf.mxu1 }
 0x3bc   :  { %v896_v53 = vmul.f32 %v878_v43, %v878_v43  ;;  %v889_v6 = vsel %vm2468_vm11, %v878_v43, 0.0 }
 0x3bd   :  { %v890_v50 = vadd.f32 %v889_v6, %v888_v37 }
 0x3be   :  { %v902_v25 = vsel %vm2469_vm7, %v896_v53, 0.0 }
 0x3bf   :  { %891 = vadd.xlane.f32.xlu2 %v890_v50  ;;  %v903_v11 = vadd.f32 %v902_v25, %v901_v46 }
 0x3c1   :  { %904 = vadd.xlane.f32.xlu1 %v903_v11 }
 0x3c3   :  { %v880_v9 = vpop.f32.mrf.mxu3 }
 0x432   :  { %v892_v16 = vpop.xlane.xlu2 %891 }
 0x433   :  { %v906_v27 = vmul.f32 0.001953125, %v892_v16 }
 0x434   :  { %v905_v38 = vpop.xlane.xlu1 %904 }
 0x435   :  { %v908_v4 = vmul.f32 %v906_v27, %v906_v27  ;;  %v907_v32 = vmul.f32 0.001953125, %v905_v38 }
 0x437   :  { %v909_v63 = vsub.f32 %v907_v32, %v908_v4 }
 0x439   :  { %v910_v10 = vmax.f32 %v909_v63, 0.0 }
 0x43b   :  { %v911_v3 = vadd.f32 1e-05, %v910_v10 }
 0x43d   :  { %1173 = vrsqrt.f32 %v911_v3  ;;  %vm918_vm3 = vweird.f32 %v911_v3 }
 0x443   :  { %v1174_v22 = vpop.eup %1173 }
 0x444   :  { %v913_v47 = vmul.f32 %v1174_v22, %v911_v3  ;;  %vm919_vm14 = vweird.f32 %v1174_v22 }
 0x445   :  { %vm920_vm4 = vmor %vm918_vm3, %vm919_vm14 }
 0x446   :  { %v914_v21 = vmul.f32 %v1174_v22, %v913_v47 }
 0x448   :  { %v915_v15 = vmul.f32 0.5, %v914_v21 }
 0x44a   :  { %v916_v57 = vsub.f32 1.5, %v915_v15 }
 0x44c   :  { %v917_v12 = vmul.f32 %v1174_v22, %v916_v57 }
 0x44e   :  { %v921_v51 = vsel %vm920_vm4, %v1174_v22, %v917_v12 }
 0x44f   :  { %v922_v28 = vmul.f32 %v921_v51, %v882_v20 }
 0x451   :  { %927 = vperm.xlu0 %1090, %v922_v28   ;;  %v923_v59 = vmul.f32 %v922_v28, %v906_v27 }
 0x453   :  { %v924_v23 = vsub.f32 %v883_v1, %v923_v59 }
 0x459   :  { %936 = vperm.xlu0 %1090, %v924_v23  }
 0x4c3   :  { %v928_v39 = vpop.permute.xlu0 %927 }
 0x4c4   :  { %v930_v42 = vmul.f32 %v928_v39, %v839_v44  ;;  %v931_v40 = vmul.f32 %v928_v39, %v852_v30  ;;  %v932_v54 = vmul.f32 %v928_v39, %v865_v60  ;;  %v933_v0 = vmul.f32 %v928_v39, %v878_v43 }
 0x4cb   :  { %v937_v52 = vpop.permute.xlu0 %936 }
 0x4cc   :  { %v939_v18 = vadd.f32 %v937_v52, %v930_v42  ;;  %v940_v62 = vadd.f32 %v937_v52, %v931_v40  ;;  %v941_v31 = vadd.f32 %v937_v52, %v932_v54  ;;  %v942_v19 = vadd.f32 %v937_v52, %v933_v0 }
 0x4ce   :  { %v954_v7 = vadd.f32 %v946_v34, %v939_v18  ;;  %v955_v26 = vadd.f32 %v947_v24, %v940_v62  ;;  %v956_v45 = vadd.f32 %v948_v48, %v941_v31  ;;  %v957_v41 = vadd.f32 %v949_v56, %v942_v19 }
 0x4d0   :  { %v959_v33 = vmax.f32 %v955_v26, 0.0  ;;  %v961_v5 = vmax.f32 %v957_v41, 0.0  ;;  %v958_v60 = vmax.f32 %v954_v7, 0.0  ;;  %v960_v44 = vmax.f32 %v956_v45, 0.0 }
 0x4d2   :  { %v966_v30 = vrot.slane %v959_v33, 4  ;;  %v967_v35 = vrot.slane %v961_v5, 4 }
 0x4d4   :  { %v968_v8 = vsel %vm2470_vm5, %v958_v60, %v966_v30  ;;  %v969_v13 = vsel %vm2471_vm8, %v960_v44, %v967_v35 }
 0x4d5   :  { %972 = vst [vmem:[#allocation5] sm:$0xff] %v968_v8 }
 0x4d6   :  { %973 = vst [vmem:[#allocation5 + $0x8] sm:$0xff] %v969_v13 }
 0x4d7   :  { %984 = dma.vmem_to_hbm [thread:$0]  %s980_s8, 256, %s982_s12, [#allocation4]  }
 0x4d8   :  { %1225 = dma.done.wait [#allocation4], 256  }
 0x4d9   :  { %1226 = vsyncadd [#allocation4], 4294967040 }
 0x4da   :  { %989 = vsyncpa [#allocation3], 1 }
 0x4db   :  { %990 = vsyncpa [#allocation4], 1 }

</bundles_post_ra>
